<compile_context>
chip_gen: v5e
topology: v5e:2x2
jax: 0.10.0
libtpu: 0.0.40
codegen_flags: <defaults>
</compile_context>

<pallas_src>
import functools

import jax
import jax.numpy as jnp
from jax.experimental import pallas as pl
from jax.experimental.pallas import tpu as pltpu

IN_DIM = 100
IN_PAD = 128            # latent padded to one full lane tile (K aligned)
H1 = 256
H2 = 512
OUT_DIM = 28 * 28       # 784
OUT_PAD = 896           # 7 * 128, lane-dense output slab


def generator_kernel(x_ref, w1_ref, b1_ref, w2_ref, b2_ref, w3_ref, b3_ref, o_ref):
    # Layer 1: Linear(128 -> 256) + ReLU.  bf16 operands, f32 MXU accumulate.
    h1 = jnp.dot(x_ref[...], w1_ref[...], preferred_element_type=jnp.float32)
    h1 = jnp.maximum(h1 + b1_ref[...], 0.0)
    # Layer 2: Linear(256 -> 512) + ReLU
    h2 = jnp.dot(h1.astype(jnp.bfloat16), w2_ref[...],
                 preferred_element_type=jnp.float32)
    h2 = jnp.maximum(h2 + b2_ref[...], 0.0)
    # Layer 3: Linear(512 -> 896 [784 valid cols]) + Tanh
    h3 = jnp.dot(h2.astype(jnp.bfloat16), w3_ref[...],
                 preferred_element_type=jnp.float32)
    o_ref[...] = jnp.tanh(h3 + b3_ref[...])


def _round_up(n, m):
    return -(-n // m) * m


@functools.partial(jax.jit, static_argnames=("block_b",))
def generator_forward(x, params, *, block_b=256):
    """x: (B, 100) f32 latent noise. Returns (B, 28, 28) f32 images."""
    w1, b1, w2, b2, w3, b3 = params
    B = x.shape[0]

    # --- glue: pad odd dims to lane-friendly sizes, cast matmul operands to bf16 ---
    B_pad = _round_up(max(B, 1), 8)          # sublane-aligned batch
    tb = min(block_b, B_pad)                 # batch tile (256 keeps VMEM tiny even on v7x)

    x_p = jnp.zeros((B_pad, IN_PAD), jnp.bfloat16)
    x_p = x_p.at[:B, :IN_DIM].set(x.astype(jnp.bfloat16))
    w1_p = jnp.zeros((IN_PAD, H1), jnp.bfloat16).at[:IN_DIM, :].set(w1.astype(jnp.bfloat16))
    w2_b = w2.astype(jnp.bfloat16)
    w3_p = jnp.zeros((H2, OUT_PAD), jnp.bfloat16).at[:, :OUT_DIM].set(w3.astype(jnp.bfloat16))
    b3_p = jnp.zeros((1, OUT_PAD), jnp.float32).at[:, :OUT_DIM].set(b3)

    grid = (pl.cdiv(B_pad, tb),)

    # Weights/biases: constant block index -> stay VMEM-resident across steps.
    const2d = lambda shape: pl.BlockSpec(shape, lambda i: (0, 0))

    out_flat = pl.pallas_call(
        generator_kernel,
        out_shape=jax.ShapeDtypeStruct((B_pad, OUT_PAD), jnp.float32),
        grid=grid,
        in_specs=[
            pl.BlockSpec((tb, IN_PAD), lambda i: (i, 0)),   # x: batch-tiled
            const2d((IN_PAD, H1)), const2d((1, H1)),
            const2d((H1, H2)),     const2d((1, H2)),
            const2d((H2, OUT_PAD)), const2d((1, OUT_PAD)),
        ],
        out_specs=pl.BlockSpec((tb, OUT_PAD), lambda i: (i, 0)),
        compiler_params=pltpu.CompilerParams(
            dimension_semantics=("parallel",),   # v7x: shard batch tiles across 2 TCs
        ),
    )(x_p, w1_p, b1, w2_b, b2, w3_p, b3_p)

    # Same as img.view(-1, 28, 28), dropping batch/feature padding.
    return out_flat[:B, :OUT_DIM].reshape(B, 28, 28)


def init_params(key):
    """Deterministic PyTorch-style (Kaiming-uniform-ish) init. Weights stored (in, out)."""
    ks = jax.random.split(key, 6)

    def layer(kw, kb, fan_in, fan_out):
        bound = 1.0 / jnp.sqrt(jnp.float32(fan_in))
        w = jax.random.uniform(kw, (fan_in, fan_out), jnp.float32, -bound, bound)
        b = jax.random.uniform(kb, (1, fan_out), jnp.float32, -bound, bound)
        return w, b

    w1, b1 = layer(ks[0], ks[1], IN_DIM, H1)
    w2, b2 = layer(ks[2], ks[3], H1, H2)
    w3, b3 = layer(ks[4], ks[5], H2, OUT_DIM)
    return (w1, b1, w2, b2, w3, b3)


def reference_forward(x, params):
    """Pure-JAX reference with the same bf16 operand rounding (f32 accumulate)."""
    w1, b1, w2, b2, w3, b3 = params
    bf = lambda a: a.astype(jnp.bfloat16).astype(jnp.float32)
    h = jnp.maximum(bf(x) @ bf(w1) + b1, 0.0)
    h = jnp.maximum(bf(h) @ bf(w2) + b2, 0.0)
    y = jnp.tanh(bf(h) @ bf(w3) + b3)
    return y.reshape(-1, 28, 28)


if __name__ == "__main__":
    key = jax.random.PRNGKey(0)
    k_param, k_x = jax.random.split(key)

    B = 2
    params = init_params(k_param)
    x = jax.random.normal(k_x, (B, IN_DIM), jnp.float32)  # latent noise vectors

    img = jax.block_until_ready(generator_forward(x, params))

    ref = reference_forward(x, params)
    assert img.shape == (B, 28, 28), img.shape
    assert bool(jnp.all(jnp.isfinite(img))), "non-finite output"
    assert jnp.allclose(img, ref, atol=2e-2, rtol=2e-2), "mismatch vs reference"

    print("KERNEL_OK")
</pallas_src>

<mosaic_0001>
module attributes {stable_mosaic.version = 11 : i64} {
  func.func @generator_kernel(%arg0: i32, %arg1: memref<8x128xbf16, #tpu.memory_space<vmem>>, %arg2: memref<128x256xbf16, #tpu.memory_space<vmem>>, %arg3: memref<1x256xf32, #tpu.memory_space<vmem>>, %arg4: memref<256x512xbf16, #tpu.memory_space<vmem>>, %arg5: memref<1x512xf32, #tpu.memory_space<vmem>>, %arg6: memref<512x896xbf16, #tpu.memory_space<vmem>>, %arg7: memref<1x896xf32, #tpu.memory_space<vmem>>, %arg8: memref<8x896xf32, #tpu.memory_space<vmem>>) attributes {dimension_semantics = [#tpu.dimension_semantics<parallel>], iteration_bounds = array<i64: 1>, scalar_prefetch = 0 : i64, scratch_operands = 0 : i64, tpu.core_type = #tpu.core_type<tc>, window_params = [{transform_indices = @transform_0, window_bounds = array<i64: 8, 128>}, {pipeline_mode = #tpu.pipeline_mode<synchronous>, transform_indices = @transform_1, window_bounds = array<i64: 128, 256>}, {pipeline_mode = #tpu.pipeline_mode<synchronous>, transform_indices = @transform_2, window_bounds = array<i64: 1, 256>}, {pipeline_mode = #tpu.pipeline_mode<synchronous>, transform_indices = @transform_3, window_bounds = array<i64: 256, 512>}, {pipeline_mode = #tpu.pipeline_mode<synchronous>, transform_indices = @transform_4, window_bounds = array<i64: 1, 512>}, {pipeline_mode = #tpu.pipeline_mode<synchronous>, transform_indices = @transform_5, window_bounds = array<i64: 512, 896>}, {pipeline_mode = #tpu.pipeline_mode<synchronous>, transform_indices = @transform_6, window_bounds = array<i64: 1, 896>}, {transform_indices = @transform_7, window_bounds = array<i64: 8, 896>}]} {
    %c0 = arith.constant 0 : index
    %c0_0 = arith.constant 0 : index
    %0 = vector.load %arg1[%c0, %c0_0] : memref<8x128xbf16, #tpu.memory_space<vmem>>, vector<8x128xbf16>
    %c0_1 = arith.constant 0 : index
    %c0_2 = arith.constant 0 : index
    %1 = vector.load %arg2[%c0_1, %c0_2] : memref<128x256xbf16, #tpu.memory_space<vmem>>, vector<128x256xbf16>
    %cst = arith.constant dense<0.000000e+00> : vector<8x256xf32>
    %2 = tpu.matmul %0, %1, %cst {dimension_numbers = #tpu.dot_dimension_numbers<[1], [0], [0], [1], [0, 0, 1, 1], [], []>} : vector<8x128xbf16>, vector<128x256xbf16>, vector<8x256xf32> -> vector<8x256xf32>
    %c0_3 = arith.constant 0 : index
    %c0_4 = arith.constant 0 : index
    %3 = vector.load %arg3[%c0_3, %c0_4] : memref<1x256xf32, #tpu.memory_space<vmem>>, vector<1x256xf32>
    %4 = vector.broadcast %3 : vector<1x256xf32> to vector<8x256xf32>
    %5 = arith.addf %2, %4 : vector<8x256xf32>
    %cst_5 = arith.constant 0.000000e+00 : f32
    %6 = vector.broadcast %cst_5 : f32 to vector<8x256xf32>
    %7 = arith.maximumf %5, %6 : vector<8x256xf32>
    %8 = arith.truncf %7 : vector<8x256xf32> to vector<8x256xbf16>
    %c0_6 = arith.constant 0 : index
    %c0_7 = arith.constant 0 : index
    %9 = vector.load %arg4[%c0_6, %c0_7] : memref<256x512xbf16, #tpu.memory_space<vmem>>, vector<256x512xbf16>
    %cst_8 = arith.constant dense<0.000000e+00> : vector<8x512xf32>
    %10 = tpu.matmul %8, %9, %cst_8 {dimension_numbers = #tpu.dot_dimension_numbers<[1], [0], [0], [1], [0, 0, 1, 1], [], []>} : vector<8x256xbf16>, vector<256x512xbf16>, vector<8x512xf32> -> vector<8x512xf32>
    %c0_9 = arith.constant 0 : index
    %c0_10 = arith.constant 0 : index
    %11 = vector.load %arg5[%c0_9, %c0_10] : memref<1x512xf32, #tpu.memory_space<vmem>>, vector<1x512xf32>
    %12 = vector.broadcast %11 : vector<1x512xf32> to vector<8x512xf32>
    %13 = arith.addf %10, %12 : vector<8x512xf32>
    %cst_11 = arith.constant 0.000000e+00 : f32
    %14 = vector.broadcast %cst_11 : f32 to vector<8x512xf32>
    %15 = arith.maximumf %13, %14 : vector<8x512xf32>
    %16 = arith.truncf %15 : vector<8x512xf32> to vector<8x512xbf16>
    %c0_12 = arith.constant 0 : index
    %c0_13 = arith.constant 0 : index
    %17 = vector.load %arg6[%c0_12, %c0_13] : memref<512x896xbf16, #tpu.memory_space<vmem>>, vector<512x896xbf16>
    %cst_14 = arith.constant dense<0.000000e+00> : vector<8x896xf32>
    %18 = tpu.matmul %16, %17, %cst_14 {dimension_numbers = #tpu.dot_dimension_numbers<[1], [0], [0], [1], [0, 0, 1, 1], [], []>} : vector<8x512xbf16>, vector<512x896xbf16>, vector<8x896xf32> -> vector<8x896xf32>
    %c0_15 = arith.constant 0 : index
    %c0_16 = arith.constant 0 : index
    %19 = vector.load %arg7[%c0_15, %c0_16] : memref<1x896xf32, #tpu.memory_space<vmem>>, vector<1x896xf32>
    %20 = vector.broadcast %19 : vector<1x896xf32> to vector<8x896xf32>
    %21 = arith.addf %18, %20 : vector<8x896xf32>
    %22 = math.tanh %21 : vector<8x896xf32>
    %c0_17 = arith.constant 0 : index
    %c0_18 = arith.constant 0 : index
    %23 = vector.load %arg8[%c0_17, %c0_18] : memref<8x896xf32, #tpu.memory_space<vmem>>, vector<8x896xf32>
    tpu.vector_store %arg8[%c0_17, %c0_18], %22 {strides = array<i32>} : memref<8x896xf32, #tpu.memory_space<vmem>>, vector<8x896xf32>,
    return
  }
  func.func @transform_0(%arg0: i32) -> (i32, i32) {
    %c0_i32 = arith.constant 0 : i32
    %c0_i32_0 = arith.constant 0 : i32
    return %arg0, %c0_i32 : i32, i32
  }
  func.func @transform_1(%arg0: i32) -> (i32, i32) {
    %c0_i32 = arith.constant 0 : i32
    %c0_i32_0 = arith.constant 0 : i32
    %c0_i32_1 = arith.constant 0 : i32
    return %c0_i32, %c0_i32_0 : i32, i32
  }
  func.func @transform_2(%arg0: i32) -> (i32, i32) {
    %c0_i32 = arith.constant 0 : i32
    %c0_i32_0 = arith.constant 0 : i32
    %c0_i32_1 = arith.constant 0 : i32
    return %c0_i32, %c0_i32_0 : i32, i32
  }
  func.func @transform_3(%arg0: i32) -> (i32, i32) {
    %c0_i32 = arith.constant 0 : i32
    %c0_i32_0 = arith.constant 0 : i32
    %c0_i32_1 = arith.constant 0 : i32
    return %c0_i32, %c0_i32_0 : i32, i32
  }
  func.func @transform_4(%arg0: i32) -> (i32, i32) {
    %c0_i32 = arith.constant 0 : i32
    %c0_i32_0 = arith.constant 0 : i32
    %c0_i32_1 = arith.constant 0 : i32
    return %c0_i32, %c0_i32_0 : i32, i32
  }
  func.func @transform_5(%arg0: i32) -> (i32, i32) {
    %c0_i32 = arith.constant 0 : i32
    %c0_i32_0 = arith.constant 0 : i32
    %c0_i32_1 = arith.constant 0 : i32
    return %c0_i32, %c0_i32_0 : i32, i32
  }
  func.func @transform_6(%arg0: i32) -> (i32, i32) {
    %c0_i32 = arith.constant 0 : i32
    %c0_i32_0 = arith.constant 0 : i32
    %c0_i32_1 = arith.constant 0 : i32
    return %c0_i32, %c0_i32_0 : i32, i32
  }
  func.func @transform_7(%arg0: i32) -> (i32, i32) {
    %c0_i32 = arith.constant 0 : i32
    %c0_i32_0 = arith.constant 0 : i32
    return %arg0, %c0_i32 : i32, i32
  }
}

</mosaic_0001>

<bundles_post_ra>
// kernel: generator_forward.1
= control target key start
LH: loop header
LB: loop body
LE: loop exit
PB: predicated region body
PF: predicated region fallthrough
CT: control target
= control target key end

     0   :  { %s5968_s1 = inlined_call_operand.vmem [shape: bf16[128,256], index: 1, kind: input, shape index: {}]   ;;  %s5969_s3 = inlined_call_operand.vmem [shape: bf16[256,512], index: 3, kind: input, shape index: {}]   ;;  %s5970_s0 = inlined_call_operand.vmem [shape: bf16[8,128], index: 0, kind: input, shape index: {}]   ;;  %s5971_s2 = inlined_call_operand.vmem [shape: f32[1,256], index: 2, kind: input, shape index: {}]   ;;  %s5972_s5 = inlined_call_operand.vmem [shape: bf16[512,896], index: 5, kind: input, shape index: {}]   ;;  %s5973_s4 = inlined_call_operand.vmem [shape: f32[1,512], index: 4, kind: input, shape index: {}]   ;;  %s5974_s6 = inlined_call_operand.vmem [shape: f32[1,896], index: 6, kind: input, shape index: {}]   ;;  %s5975_s7 = inlined_call_operand.vmem [shape: f32[8,896], index: 7, kind: output, shape index: {}]  }
   0x1   :  { %v2529_v0 = vld [vmem:[%s5968_s1 + $0x70] sm:$0xf]  ;;  %v3702_v1 = vld [vmem:[%s5968_s1 + $0x74] sm:$0xf0]  ;;  %v3701_v2 = vld [vmem:[%s5968_s1 + $0x74] sm:$0xf] }
   0x2   :  { %v2530_v3 = vor.u32 %v3702_v1, %v2529_v0  ;;  %v2531_v4 = vld [vmem:[%s5968_s1 + $0x78] sm:$0xf0]  ;;  %v2521_v5 = vld [vmem:[%s5968_s1 + $0x60] sm:$0xf]  ;;  %v3700_v6 = vld [vmem:[%s5968_s1 + $0x64] sm:$0xf0] }
   0x3   :  { %v2534_v7 = vor.u32 %v3701_v2, %v2531_v4  ;;  %v3699_v8 = vld [vmem:[%s5968_s1 + $0x64] sm:$0xf]  ;;  %v2523_v9 = vld [vmem:[%s5968_s1 + $0x68] sm:$0xf0]  ;;  %v2522_v10 = vor.u32 %v3700_v6, %v2521_v5  ;;  %v2513_v12 = vld [vmem:[%s5968_s1 + $0x50] sm:$0xf] }
   0x4   :  { %129 = vmatpush.bf16.msra.mxu0 %v2530_v3  ;;  %v2526_v11 = vor.u32 %v3699_v8, %v2523_v9  ;;  %v3698_v13 = vld [vmem:[%s5968_s1 + $0x54] sm:$0xf0]  ;;  %v3697_v14 = vld [vmem:[%s5968_s1 + $0x54] sm:$0xf]  ;;  %v2515_v15 = vld [vmem:[%s5968_s1 + $0x58] sm:$0xf0] }
   0x5   :  { %142 = vmatpush.bf16.msra.mxu1 %v2534_v7  ;;  %v2514_v16 = vor.u32 %v3698_v13, %v2513_v12  ;;  %v2518_v17 = vor.u32 %v3697_v14, %v2515_v15  ;;  %v2505_v18 = vld [vmem:[%s5968_s1 + $0x40] sm:$0xf]  ;;  %v3696_v19 = vld [vmem:[%s5968_s1 + $0x44] sm:$0xf0]  ;;  %v3695_v20 = vld [vmem:[%s5968_s1 + $0x44] sm:$0xf] }
   0x6   :  { %v2507_v21 = vld [vmem:[%s5968_s1 + $0x48] sm:$0xf0]  ;;  %v2506_v22 = vor.u32 %v3696_v19, %v2505_v18  ;;  %v2649_v23 = vld [vmem:[%s5969_s3 + $0xe0] sm:$0xf]  ;;  %v3733_v24 = vld [vmem:[%s5969_s3 + $0xec] sm:$0xf0] }
   0x7   :  { %v2777_v25 = vld [vmem:[%s5969_s3 + $0x1e0] sm:$0xf]  ;;  %v2510_v26 = vor.u32 %v3695_v20, %v2507_v21  ;;  %v2497_v27 = vld [vmem:[%s5968_s1 + $0x30] sm:$0xf]  ;;  %v3694_v28 = vld [vmem:[%s5968_s1 + $0x34] sm:$0xf0]  ;;  %v2650_v29 = vor.u32 %v3733_v24, %v2649_v23 }
   0x8   :  { %130 = vmatpush.bf16.msra.mxu0 %v2522_v10  ;;  %v3765_v30 = vld [vmem:[%s5969_s3 + $0x1ec] sm:$0xf0]  ;;  %v3693_v31 = vld [vmem:[%s5968_s1 + $0x34] sm:$0xf]  ;;  %v2499_v32 = vld [vmem:[%s5968_s1 + $0x38] sm:$0xf0]  ;;  %v2498_v38 = vor.u32 %v3694_v28, %v2497_v27 }
   0x9   :  { %143 = vmatpush.bf16.msra.mxu1 %v2526_v11  ;;  %v2778_v33 = vor.u32 %v3765_v30, %v2777_v25  ;;  %v2633_v34 = vld [vmem:[%s5969_s3 + $0xc0] sm:$0xf]  ;;  %553 = vmatpush.bf16.msra.mxu2 %v2650_v29  ;;  %v3729_v35 = vld [vmem:[%s5969_s3 + $0xcc] sm:$0xf0]  ;;  %v3692_v40 = vld [vmem:[%s5968_s1 + $0x24] sm:$0xf0]  ;;  %v2502_v43 = vor.u32 %v3693_v31, %v2499_v32 }
   0xa   :  { %v2761_v36 = vld [vmem:[%s5969_s3 + $0x1c0] sm:$0xf]  ;;  %v3761_v37 = vld [vmem:[%s5969_s3 + $0x1cc] sm:$0xf0]  ;;  %v2634_v41 = vor.u32 %v3729_v35, %v2633_v34  ;;  %v3691_v44 = vld [vmem:[%s5968_s1 + $0x24] sm:$0xf] }
   0xb   :  { %v2489_v39 = vld [vmem:[%s5968_s1 + $0x20] sm:$0xf]  ;;  %566 = vmatpush.bf16.msra.mxu3 %v2778_v33  ;;  %v2762_v42 = vor.u32 %v3761_v37, %v2761_v36  ;;  %v3725_v46 = vld [vmem:[%s5969_s3 + $0xac] sm:$0xf0]  ;;  %v2491_v47 = vld [vmem:[%s5968_s1 + $0x28] sm:$0xf0] }
   0xc   :  { %131 = vmatpush.bf16.msra.mxu0 %v2514_v16  ;;  %v2617_v45 = vld [vmem:[%s5969_s3 + $0xa0] sm:$0xf]  ;;  %v3757_v49 = vld [vmem:[%s5969_s3 + $0x1ac] sm:$0xf0]  ;;  %v2490_v51 = vor.u32 %v3692_v40, %v2489_v39  ;;  %v2494_v56 = vor.u32 %v3691_v44, %v2491_v47  ;;  %v3690_v57 = vld [vmem:[%s5968_s1 + $0x14] sm:$0xf0] }
   0xd   :  { %144 = vmatpush.bf16.msra.mxu1 %v2518_v17  ;;  %v2745_v48 = vld [vmem:[%s5969_s3 + $0x1a0] sm:$0xf]  ;;  %554 = vmatpush.bf16.msra.mxu2 %v2634_v41  ;;  %v2618_v50 = vor.u32 %v3725_v46, %v2617_v45  ;;  %v2481_v52 = vld [vmem:[%s5968_s1 + $0x10] sm:$0xf]  ;;  %v3689_v60 = vld [vmem:[%s5968_s1 + $0x14] sm:$0xf] }
   0xe   :  { %v2746_v53 = vor.u32 %v3757_v49, %v2745_v48  ;;  %v2601_v54 = vld [vmem:[%s5969_s3 + $0x80] sm:$0xf]  ;;  %v3721_v55 = vld [vmem:[%s5969_s3 + $0x8c] sm:$0xf0]  ;;  %v2483_v61 = vld [vmem:[%s5968_s1 + $0x18] sm:$0xf0]  ;;  %v2482_v0 = vor.u32 %v3690_v57, %v2481_v52 }
   0xf   :  { %567 = vmatpush.bf16.msra.mxu3 %v2762_v42  ;;  %v2729_v58 = vld [vmem:[%s5969_s3 + $0x180] sm:$0xf]  ;;  %v3753_v59 = vld [vmem:[%s5969_s3 + $0x18c] sm:$0xf0]  ;;  %v2602_v63 = vor.u32 %v3721_v55, %v2601_v54  ;;  %v3688_v1 = vld [vmem:[%s5968_s1 + $0x4] sm:$0xf0]  ;;  %v2486_v5 = vor.u32 %v3689_v60, %v2483_v61 }
  0x10   :  { %132 = vmatpush.bf16.msra.mxu0 %v2506_v22  ;;  %v2473_v62 = vld [vmem:[%s5968_s1] sm:$0xf]  ;;  %v2730_v2 = vor.u32 %v3753_v59, %v2729_v58  ;;  %v3717_v4 = vld [vmem:[%s5969_s3 + $0x6c] sm:$0xf0]  ;;  %v3687_v6 = vld [vmem:[%s5968_s1 + $0x4] sm:$0xf] }
  0x11   :  { %145 = vmatpush.bf16.msra.mxu1 %v2510_v26  ;;  %555 = vmatpush.bf16.msra.mxu2 %v2618_v50  ;;  %v2585_v3 = vld [vmem:[%s5969_s3 + $0x60] sm:$0xf]  ;;  %v3749_v8 = vld [vmem:[%s5969_s3 + $0x16c] sm:$0xf0]  ;;  %v2475_v9 = vld [vmem:[%s5968_s1 + $0x8] sm:$0xf0]  ;;  %v2474_v15 = vor.u32 %v3688_v1, %v2473_v62 }
  0x12   :  { %v2713_v7 = vld [vmem:[%s5969_s3 + $0x160] sm:$0xf]  ;;  %v3731_v10 = vld [vmem:[%s5969_s3 + $0xe4] sm:$0xf]  ;;  %v2651_v11 = vld [vmem:[%s5969_s3 + $0xf0] sm:$0xf0]  ;;  %v2586_v14 = vor.u32 %v3717_v4, %v2585_v3  ;;  %v2478_v19 = vor.u32 %v3687_v6, %v2475_v9 }
  0x13   :  { %568 = vmatpush.bf16.msra.mxu3 %v2746_v53  ;;  %v3763_v12 = vld [vmem:[%s5969_s3 + $0x1e4] sm:$0xf]  ;;  %v2779_v13 = vld [vmem:[%s5969_s3 + $0x1f0] sm:$0xf0]  ;;  %v2714_v16 = vor.u32 %v3749_v8, %v2713_v7  ;;  %v2569_v17 = vld [vmem:[%s5969_s3 + $0x40] sm:$0xf]  ;;  %v2654_v20 = vor.u32 %v3731_v10, %v2651_v11 }
  0x14   :  { %133 = vmatpush.bf16.msra.mxu0 %v2498_v38  ;;  %v3713_v18 = vld [vmem:[%s5969_s3 + $0x4c] sm:$0xf0]  ;;  %v2697_v21 = vld [vmem:[%s5969_s3 + $0x140] sm:$0xf]  ;;  %v2782_v23 = vor.u32 %v3763_v12, %v2779_v13  ;;  %v3727_v24 = vld [vmem:[%s5969_s3 + $0xc4] sm:$0xf] }
  0x15   :  { %146 = vmatpush.bf16.msra.mxu1 %v2502_v43  ;;  %556 = vmatpush.bf16.msra.mxu2 %v2602_v63  ;;  %v3745_v22 = vld [vmem:[%s5969_s3 + $0x14c] sm:$0xf0]  ;;  %v2635_v25 = vld [vmem:[%s5969_s3 + $0xd0] sm:$0xf0]  ;;  %v3759_v26 = vld [vmem:[%s5969_s3 + $0x1c4] sm:$0xf]  ;;  %v2570_v28 = vor.u32 %v3713_v18, %v2569_v17 }
  0x16   :  { %v2763_v27 = vld [vmem:[%s5969_s3 + $0x1d0] sm:$0xf0]  ;;  %v26_v29 = vld [vmem:[%s5970_s0] sm:$0xf]  ;;  %v2698_v30 = vor.u32 %v3745_v22, %v2697_v21  ;;  %v3709_v32 = vld [vmem:[%s5969_s3 + $0x2c] sm:$0xf0]  ;;  %v2638_v33 = vor.u32 %v3727_v24, %v2635_v25 }
  0x17   :  { %569 = vmatpush.bf16.msra.mxu3 %v2730_v2  ;;  %v2553_v31 = vld [vmem:[%s5969_s3 + $0x20] sm:$0xf]  ;;  %v3741_v35 = vld [vmem:[%s5969_s3 + $0x12c] sm:$0xf0]  ;;  %v2766_v36 = vor.u32 %v3759_v26, %v2763_v27  ;;  %v3723_v37 = vld [vmem:[%s5969_s3 + $0xa4] sm:$0xf] }
  0x18   :  { %134 = vmatpush.bf16.msra.mxu0 %v2490_v51  ;;  %v2681_v34 = vld [vmem:[%s5969_s3 + $0x120] sm:$0xf]  ;;  %v2619_v38 = vld [vmem:[%s5969_s3 + $0xb0] sm:$0xf0]  ;;  %v3755_v39 = vld [vmem:[%s5969_s3 + $0x1a4] sm:$0xf]  ;;  %v2554_v41 = vor.u32 %v3709_v32, %v2553_v31 }
  0x19   :  { %147 = vmatpush.bf16.msra.mxu1 %v2494_v56  ;;  %557 = vmatpush.bf16.msra.mxu2 %v2586_v14  ;;  %v2747_v40 = vld [vmem:[%s5969_s3 + $0x1b0] sm:$0xf0]  ;;  %v3719_v42 = vld [vmem:[%s5969_s3 + $0x84] sm:$0xf]  ;;  %v2682_v43 = vor.u32 %v3741_v35, %v2681_v34  ;;  %v2537_v44 = vld [vmem:[%s5969_s3] sm:$0xf]  ;;  %v2622_v47 = vor.u32 %v3723_v37, %v2619_v38 }
  0x1a   :  { %v3705_v45 = vld [vmem:[%s5969_s3 + $0xc] sm:$0xf0]  ;;  %v2665_v46 = vld [vmem:[%s5969_s3 + $0x100] sm:$0xf]  ;;  %v2657_v49 = vld [vmem:[%s5969_s3 + $0xe8] sm:$0xf]  ;;  %v2750_v51 = vor.u32 %v3755_v39, %v2747_v40 }
  0x1b   :  { %570 = vmatpush.bf16.msra.mxu3 %v2714_v16  ;;  %v3737_v48 = vld [vmem:[%s5969_s3 + $0x10c] sm:$0xf0]  ;;  %v3734_v50 = vld [vmem:[%s5969_s3 + $0xf4] sm:$0xf0]  ;;  %v2603_v52 = vld [vmem:[%s5969_s3 + $0x90] sm:$0xf0]  ;;  %v2538_v57 = vor.u32 %v3705_v45, %v2537_v44 }
  0x1c   :  { %135 = vmatpush.bf16.msra.mxu0 %v2482_v0  ;;  %v2785_v53 = vld [vmem:[%s5969_s3 + $0x1e8] sm:$0xf]  ;;  %v3766_v54 = vld [vmem:[%s5969_s3 + $0x1f4] sm:$0xf0]  ;;  %v3751_v55 = vld [vmem:[%s5969_s3 + $0x184] sm:$0xf]  ;;  %v2666_v58 = vor.u32 %v3737_v48, %v2665_v46  ;;  %v2658_v59 = vor.u32 %v3734_v50, %v2657_v49  ;;  %v2606_v60 = vor.u32 %v3719_v42, %v2603_v52 }
  0x1d   :  { %148 = vmatpush.bf16.msra.mxu1 %v2486_v5  ;;  %558 = vmatpush.bf16.msra.mxu2 %v2570_v28  ;;  %v2731_v56 = vld [vmem:[%s5969_s3 + $0x190] sm:$0xf0]  ;;  %v3715_v61 = vld [vmem:[%s5969_s3 + $0x64] sm:$0xf]  ;;  %v2786_v62 = vor.u32 %v3766_v54, %v2785_v53  ;;  %v2641_v63 = vld [vmem:[%s5969_s3 + $0xc8] sm:$0xf] }
  0x1e   :  { %v3730_v0 = vld [vmem:[%s5969_s3 + $0xd4] sm:$0xf0]  ;;  %v2734_v1 = vor.u32 %v3751_v55, %v2731_v56  ;;  %v2587_v2 = vld [vmem:[%s5969_s3 + $0x70] sm:$0xf0]  ;;  %v2769_v3 = vld [vmem:[%s5969_s3 + $0x1c8] sm:$0xf] }
  0x1f   :  { %571 = vmatpush.bf16.msra.mxu3 %v2698_v30  ;;  %v3762_v4 = vld [vmem:[%s5969_s3 + $0x1d4] sm:$0xf0]  ;;  %v3747_v5 = vld [vmem:[%s5969_s3 + $0x164] sm:$0xf]  ;;  %v2715_v6 = vld [vmem:[%s5969_s3 + $0x170] sm:$0xf0]  ;;  %v2642_v7 = vor.u32 %v3730_v0, %v2641_v63  ;;  %v2590_v8 = vor.u32 %v3715_v61, %v2587_v2 }
  0x20   :  { %136 = vmatpush.bf16.msra.mxu0 %v2474_v15  ;;  %v2770_v9 = vor.u32 %v3762_v4, %v2769_v3  ;;  %v2718_v10 = vor.u32 %v3747_v5, %v2715_v6  ;;  %v3711_v11 = vld [vmem:[%s5969_s3 + $0x44] sm:$0xf]  ;;  %v2571_v12 = vld [vmem:[%s5969_s3 + $0x50] sm:$0xf0]  ;;  %v3732_v27 = vld [vmem:[%s5969_s3 + $0xec] sm:$0xf] }
  0x21   :  { %149 = vmatpush.bf16.msra.mxu1 %v2478_v19  ;;  %559 = vmatpush.bf16.msra.mxu2 %v2554_v41  ;;  %v3743_v13 = vld [vmem:[%s5969_s3 + $0x144] sm:$0xf]  ;;  %v2699_v14 = vld [vmem:[%s5969_s3 + $0x150] sm:$0xf0]  ;;  %v2574_v15 = vor.u32 %v3711_v11, %v2571_v12  ;;  %v2659_v28 = vld [vmem:[%s5969_s3 + $0xf8] sm:$0xf0] }
  0x22   :  { %v2702_v16 = vor.u32 %v3743_v13, %v2699_v14  ;;  %v3707_v17 = vld [vmem:[%s5969_s3 + $0x24] sm:$0xf]  ;;  %v2555_v18 = vld [vmem:[%s5969_s3 + $0x30] sm:$0xf0]  ;;  %v2787_v30 = vld [vmem:[%s5969_s3 + $0x1f8] sm:$0xf0] }
  0x23   :  { %137 = vmatmul.bf16.vlgmr.msra.gmra.mxu0 %v26_v29  ;;  %572 = vmatpush.bf16.msra.mxu3 %v2682_v43  ;;  %v3739_v19 = vld [vmem:[%s5969_s3 + $0x124] sm:$0xf]  ;;  %v2558_v21 = vor.u32 %v3707_v17, %v2555_v18  ;;  %v2539_v24 = vld [vmem:[%s5969_s3 + $0x10] sm:$0xf0]  ;;  %v3728_v35 = vld [vmem:[%s5969_s3 + $0xcc] sm:$0xf] }
  0x24   :  { %579 = vmatpush.bf16.msrb.mxu0 %v2654_v20  ;;  %150 = vmatmul.bf16.vlgmr.msra.gmra.mxu1 %v26_v29  ;;  %v2683_v20 = vld [vmem:[%s5969_s3 + $0x130] sm:$0xf0]  ;;  %v3735_v25 = vld [vmem:[%s5969_s3 + $0x104] sm:$0xf]  ;;  %v3764_v29 = vld [vmem:[%s5969_s3 + $0x1ec] sm:$0xf] }
  0x25   :  { %592 = vmatpush.bf16.msrb.mxu1 %v2782_v23  ;;  %560 = vmatpush.bf16.msra.mxu2 %v2538_v57  ;;  %v2686_v22 = vor.u32 %v3739_v19, %v2683_v20  ;;  %v3703_v23 = vld [vmem:[%s5969_s3 + $0x4] sm:$0xf]  ;;  %v2667_v26 = vld [vmem:[%s5969_s3 + $0x110] sm:$0xf0]  ;;  %v2790_v34 = vor.u32 %v3764_v29, %v2787_v30  ;;  %v3760_v37 = vld [vmem:[%s5969_s3 + $0x1cc] sm:$0xf] }
  0x26   :  { %v2542_v31 = vor.u32 %v3703_v23, %v2539_v24  ;;  %v2670_v32 = vor.u32 %v3735_v25, %v2667_v26  ;;  %v2771_v38 = vld [vmem:[%s5969_s3 + $0x1d8] sm:$0xf0]  ;;  %v2625_v41 = vld [vmem:[%s5969_s3 + $0xa8] sm:$0xf]  ;;  %v3726_v42 = vld [vmem:[%s5969_s3 + $0xb4] sm:$0xf0] }
  0x27   :  { %573 = vmatpush.bf16.msra.mxu3 %v2666_v58  ;;  %v2774_v40 = vor.u32 %v3760_v37, %v2771_v38  ;;  %v2753_v43 = vld [vmem:[%s5969_s3 + $0x1a8] sm:$0xf]  ;;  %v2626_v44 = vor.u32 %v3726_v42, %v2625_v41  ;;  %v3758_v45 = vld [vmem:[%s5969_s3 + $0x1b4] sm:$0xf0]  ;;  %v3724_v46 = vld [vmem:[%s5969_s3 + $0xac] sm:$0xf] }
  0x28   :  { %580 = vmatpush.bf16.msrb.mxu0 %v2638_v33  ;;  %v2662_v33 = vor.u32 %v3732_v27, %v2659_v28  ;;  %v2754_v48 = vor.u32 %v3758_v45, %v2753_v43  ;;  %v3756_v50 = vld [vmem:[%s5969_s3 + $0x1ac] sm:$0xf]  ;;  %v2609_v53 = vld [vmem:[%s5969_s3 + $0x88] sm:$0xf]  ;;  %v3722_v54 = vld [vmem:[%s5969_s3 + $0x94] sm:$0xf0] }
  0x29   :  { %593 = vmatpush.bf16.msrb.mxu1 %v2766_v36  ;;  %605 = vmatpush.bf16.msrb.mxu2 %v2658_v59  ;;  %v2643_v36 = vld [vmem:[%s5969_s3 + $0xd8] sm:$0xf0]  ;;  %v2737_v55 = vld [vmem:[%s5969_s3 + $0x188] sm:$0xf]  ;;  %v2610_v56 = vor.u32 %v3722_v54, %v2609_v53  ;;  %v3754_v57 = vld [vmem:[%s5969_s3 + $0x194] sm:$0xf0] }
  0x2a   :  { %v2646_v39 = vor.u32 %v3728_v35, %v2643_v36  ;;  %v3720_v58 = vld [vmem:[%s5969_s3 + $0x8c] sm:$0xf]  ;;  %v2611_v59 = vld [vmem:[%s5969_s3 + $0x98] sm:$0xf0]  ;;  %v3718_v2 = vld [vmem:[%s5969_s3 + $0x74] sm:$0xf0] }
  0x2b   :  { %618 = vmatpush.bf16.msrb.mxu3 %v2786_v62  ;;  %v2614_v61 = vor.u32 %v3720_v58, %v2611_v59  ;;  %v3752_v62 = vld [vmem:[%s5969_s3 + $0x18c] sm:$0xf]  ;;  %v2739_v63 = vld [vmem:[%s5969_s3 + $0x198] sm:$0xf0]  ;;  %v2721_v3 = vld [vmem:[%s5969_s3 + $0x168] sm:$0xf] }
  0x2c   :  { %581 = vmatpush.bf16.msrb.mxu0 %v2622_v47  ;;  %v2627_v47 = vld [vmem:[%s5969_s3 + $0xb8] sm:$0xf0]  ;;  %v2742_v0 = vor.u32 %v3752_v62, %v2739_v63  ;;  %v3750_v5 = vld [vmem:[%s5969_s3 + $0x174] sm:$0xf0]  ;;  %v3716_v6 = vld [vmem:[%s5969_s3 + $0x6c] sm:$0xf] }
  0x2d   :  { %594 = vmatpush.bf16.msrb.mxu1 %v2750_v51  ;;  %606 = vmatpush.bf16.msrb.mxu2 %v2642_v7  ;;  %v2630_v49 = vor.u32 %v3724_v46, %v2627_v47  ;;  %v2755_v51 = vld [vmem:[%s5969_s3 + $0x1b8] sm:$0xf0]  ;;  %v2577_v13 = vld [vmem:[%s5969_s3 + $0x48] sm:$0xf]  ;;  %v3714_v14 = vld [vmem:[%s5969_s3 + $0x54] sm:$0xf0] }
  0x2e   :  { %v2758_v52 = vor.u32 %v3756_v50, %v2755_v51  ;;  %v2595_v7 = vld [vmem:[%s5969_s3 + $0x78] sm:$0xf0]  ;;  %v3746_v17 = vld [vmem:[%s5969_s3 + $0x154] sm:$0xf0]  ;;  %v3712_v18 = vld [vmem:[%s5969_s3 + $0x4c] sm:$0xf] }
  0x2f   :  { %619 = vmatpush.bf16.msrb.mxu3 %v2770_v9  ;;  %v2598_v9 = vor.u32 %v3716_v6, %v2595_v7  ;;  %v2723_v11 = vld [vmem:[%s5969_s3 + $0x178] sm:$0xf0]  ;;  %v2561_v24 = vld [vmem:[%s5969_s3 + $0x28] sm:$0xf]  ;;  %v3710_v26 = vld [vmem:[%s5969_s3 + $0x34] sm:$0xf0] }
  0x30   :  { %582 = vmatpush.bf16.msrb.mxu0 %v2606_v60  ;;  %v2738_v60 = vor.u32 %v3754_v57, %v2737_v55  ;;  %v2579_v19 = vld [vmem:[%s5969_s3 + $0x58] sm:$0xf0]  ;;  %v2689_v27 = vld [vmem:[%s5969_s3 + $0x128] sm:$0xf]  ;;  %v3742_v28 = vld [vmem:[%s5969_s3 + $0x134] sm:$0xf0]  ;;  %v2562_v29 = vor.u32 %v3710_v26, %v2561_v24 }
  0x31   :  { %595 = vmatpush.bf16.msrb.mxu1 %v2734_v1  ;;  %607 = vmatpush.bf16.msrb.mxu2 %v2626_v44  ;;  %v2593_v1 = vld [vmem:[%s5969_s3 + $0x68] sm:$0xf]  ;;  %v2707_v23 = vld [vmem:[%s5969_s3 + $0x158] sm:$0xf0]  ;;  %v3708_v30 = vld [vmem:[%s5969_s3 + $0x2c] sm:$0xf] }
  0x32   :  { %v2594_v4 = vor.u32 %v3718_v2, %v2593_v1  ;;  %v2691_v35 = vld [vmem:[%s5969_s3 + $0x138] sm:$0xf0]  ;;  %v2545_v36 = vld [vmem:[%s5969_s3 + $0x8] sm:$0xf]  ;;  %v3706_v37 = vld [vmem:[%s5969_s3 + $0x14] sm:$0xf0] }
  0x33   :  { %620 = vmatpush.bf16.msrb.mxu3 %v2754_v48  ;;  %v3704_v41 = vld [vmem:[%s5969_s3 + $0xc] sm:$0xf]  ;;  %v2547_v42 = vld [vmem:[%s5969_s3 + $0x18] sm:$0xf0]  ;;  %v2546_v45 = vor.u32 %v3706_v37, %v2545_v36  ;;  %v3213_v55 = vld [vmem:[%s5972_s5 + $0x348] sm:$0xf] }
  0x34   :  { %583 = vmatpush.bf16.msrb.mxu0 %v2590_v8  ;;  %v2722_v8 = vor.u32 %v3750_v5, %v2721_v3  ;;  %v3736_v43 = vld [vmem:[%s5969_s3 + $0x10c] sm:$0xf]  ;;  %v2675_v44 = vld [vmem:[%s5969_s3 + $0x118] sm:$0xf0]  ;;  %v2550_v47 = vor.u32 %v3704_v41, %v2547_v42  ;;  %v2989_v57 = vld [vmem:[%s5972_s5 + $0x188] sm:$0xf] }
  0x35   :  { %596 = vmatpush.bf16.msrb.mxu1 %v2718_v10  ;;  %608 = vmatpush.bf16.msrb.mxu2 %v2610_v56  ;;  %v3748_v10 = vld [vmem:[%s5969_s3 + $0x16c] sm:$0xf]  ;;  %v2678_v48 = vor.u32 %v3736_v43, %v2675_v44  ;;  %v3875_v56 = vld [vmem:[%s5972_s5 + $0x360] sm:$0xf0]  ;;  %v3437_v63 = vld [vmem:[%s5972_s5 + $0x508] sm:$0xf] }
  0x36   :  { %v2726_v12 = vor.u32 %v3748_v10, %v2723_v11  ;;  %v3819_v59 = vld [vmem:[%s5972_s5 + $0x1a0] sm:$0xf0]  ;;  %v3214_v3 = vor.u32 %v3875_v56, %v3213_v55  ;;  %v3868_v5 = vld [vmem:[%s5972_s5 + $0x328] sm:$0xf0]  ;;  %v3633_v11 = vld [vmem:[%s5972_s5 + $0x690] sm:$0xf] }
  0x37   :  { %621 = vmatpush.bf16.msrb.mxu3 %v2738_v60  ;;  %v3661_v60 = vld [vmem:[%s5972_s5 + $0x6c8] sm:$0xf]  ;;  %v2990_v6 = vor.u32 %v3819_v59, %v2989_v57  ;;  %v3577_v37 = vld [vmem:[%s5972_s5 + $0x620] sm:$0xf]  ;;  %v3910_v41 = vld [vmem:[%s5972_s5 + $0x478] sm:$0xf0] }
  0x38   :  { %584 = vmatpush.bf16.msrb.mxu0 %v2574_v15  ;;  %v2705_v15 = vld [vmem:[%s5969_s3 + $0x148] sm:$0xf]  ;;  %v3847_v44 = vld [vmem:[%s5972_s5 + $0x280] sm:$0xf0]  ;;  %v3073_v55 = vld [vmem:[%s5972_s5 + $0x230] sm:$0xf] }
  0x39   :  { %597 = vmatpush.bf16.msrb.mxu1 %v2702_v16  ;;  %609 = vmatpush.bf16.msrb.mxu2 %v2594_v4  ;;  %v2578_v16 = vor.u32 %v3714_v14, %v2577_v13  ;;  %v2706_v20 = vor.u32 %v3746_v17, %v2705_v15  ;;  %v3185_v4 = vld [vmem:[%s5972_s5 + $0x310] sm:$0xf]  ;;  %v3980_v13 = vld [vmem:[%s5972_s5 + $0x6a8] sm:$0xf0]  ;;  %v3101_v43 = vld [vmem:[%s5972_s5 + $0x268] sm:$0xf] }
  0x3a   :  { %v3409_v14 = vld [vmem:[%s5972_s5 + $0x4d0] sm:$0xf]  ;;  %v3924_v15 = vld [vmem:[%s5972_s5 + $0x4e8] sm:$0xf0]  ;;  %v3634_v24 = vor.u32 %v3980_v13, %v3633_v11  ;;  %v3945_v11 = vld [vmem:[%s5972_s5 + $0x590] sm:$0xf0] }
  0x3b   :  { %622 = vmatpush.bf16.msrb.mxu3 %v2722_v8  ;;  %v2961_v8 = vld [vmem:[%s5972_s5 + $0x150] sm:$0xf]  ;;  %v3410_v26 = vor.u32 %v3924_v15, %v3409_v14  ;;  %v3840_v56 = vld [vmem:[%s5972_s5 + $0x248] sm:$0xf0]  ;;  %v3889_v13 = vld [vmem:[%s5972_s5 + $0x3d0] sm:$0xf0] }
  0x3c   :  { %585 = vmatpush.bf16.msrb.mxu0 %v2558_v21  ;;  %v2582_v21 = vor.u32 %v3712_v18, %v2579_v19  ;;  %v3186_v18 = vor.u32 %v3868_v5, %v3185_v4  ;;  %v3157_v19 = vld [vmem:[%s5972_s5 + $0x2d8] sm:$0xf]  ;;  %v3784_v59 = vld [vmem:[%s5972_s5 + $0x88] sm:$0xf0]  ;;  %v3833_v4 = vld [vmem:[%s5972_s5 + $0x210] sm:$0xf0] }
  0x3d   :  { %598 = vmatpush.bf16.msrb.mxu1 %v2686_v22  ;;  %v3744_v22 = vld [vmem:[%s5969_s3 + $0x14c] sm:$0xf]  ;;  %610 = vmatpush.bf16.msrb.mxu2 %v2578_v16  ;;  %v3017_v15 = vld [vmem:[%s5972_s5 + $0x1c0] sm:$0xf] }
  0x3e   :  { %v2710_v25 = vor.u32 %v3744_v22, %v2707_v23  ;;  %v2933_v22 = vld [vmem:[%s5972_s5 + $0x118] sm:$0xf]  ;;  %v3805_v23 = vld [vmem:[%s5972_s5 + $0x130] sm:$0xf0] }
  0x3f   :  { %623 = vmatpush.bf16.msrb.mxu3 %v2706_v20  ;;  %v3861_v20 = vld [vmem:[%s5972_s5 + $0x2f0] sm:$0xf0] }
  0x40   :  { %586 = vmatpush.bf16.msrb.mxu0 %v2542_v31  ;;  %v2563_v31 = vld [vmem:[%s5969_s3 + $0x38] sm:$0xf0] }
  0x41   :  { %599 = vmatpush.bf16.msrb.mxu1 %v2670_v32  ;;  %v3740_v32 = vld [vmem:[%s5969_s3 + $0x12c] sm:$0xf]  ;;  %611 = vmatpush.bf16.msrb.mxu2 %v2562_v29  ;;  %v3917_v29 = vld [vmem:[%s5972_s5 + $0x4b0] sm:$0xf0] }
  0x42   :  { %v2694_v38 = vor.u32 %v3740_v32, %v2691_v35  ;;  %v3854_v32 = vld [vmem:[%s5972_s5 + $0x2b8] sm:$0xf0] }
  0x43   :  { %v3798_v35 = vld [vmem:[%s5972_s5 + $0xf8] sm:$0xf0] }
  0x44   :  { %631 = vmatpush.bf16.msra.mxu0 %v2662_v33  ;;  %v2690_v33 = vor.u32 %v3742_v28, %v2689_v27  ;;  %v3973_v27 = vld [vmem:[%s5972_s5 + $0x670] sm:$0xf0]  ;;  %v3381_v28 = vld [vmem:[%s5972_s5 + $0x498] sm:$0xf] }
  0x45   :  { %644 = vmatpush.bf16.msra.mxu1 %v2790_v34  ;;  %v2566_v34 = vor.u32 %v3708_v30, %v2563_v31  ;;  %612 = vmatpush.bf16.msrb.mxu2 %v2546_v45  ;;  %v3158_v30 = vor.u32 %v3861_v20, %v3157_v19  ;;  %v3129_v31 = vld [vmem:[%s5972_s5 + $0x2a0] sm:$0xf]  ;;  %v3770_v20 = vld [vmem:[%s5972_s5 + $0x18] sm:$0xf0] }
  0x46   :  { %624 = vmatpush.bf16.msrb.mxu3 %v2690_v33  ;;  %v2934_v33 = vor.u32 %v3805_v23, %v2933_v22  ;;  %v3130_v42 = vor.u32 %v3854_v32, %v3129_v31  ;;  %v2793_v19 = vld [vmem:[%s5972_s5] sm:$0xf]  ;;  %v3215_v23 = vld [vmem:[%s5972_s5 + $0x364] sm:$0xf0] }
  0x47   :  { %v3663_v31 = vld [vmem:[%s5972_s5 + $0x6e4] sm:$0xf0] }
  0x48   :  { %632 = vmatpush.bf16.msra.mxu0 %v2646_v39  ;;  %v2673_v39 = vld [vmem:[%s5969_s3 + $0x108] sm:$0xf] }
  0x49   :  { %645 = vmatpush.bf16.msra.mxu1 %v2774_v40  ;;  %v3738_v40 = vld [vmem:[%s5969_s3 + $0x114] sm:$0xf0] }
  0x4a   :  { %v2674_v46 = vor.u32 %v3738_v40, %v2673_v39  ;;  %v3966_v39 = vld [vmem:[%s5972_s5 + $0x638] sm:$0xf0]  ;;  %v3353_v40 = vld [vmem:[%s5972_s5 + $0x460] sm:$0xf] }
  0x4c   :  { %633 = vmatpush.bf16.msra.mxu0 %v2630_v49  ;;  %625 = vmatpush.bf16.msrb.mxu3 %v2674_v46  ;;  %v43_v49 = vld [vmem:[%s5971_s2] sm:$0x3]  ;;  %v2877_v46 = vld [vmem:[%s5972_s5 + $0xa8] sm:$0xf] }
  0x4d   :  { %646 = vmatpush.bf16.msra.mxu1 %v2758_v52  ;;  %v45_v50 = vperm.slane %v43_v49, 0  ;;  %v46_v51 = vperm.slane %v43_v49, 1  ;;  %v3549_v49 = vld [vmem:[%s5972_s5 + $0x5e8] sm:$0xf] }
  0x50   :  { %634 = vmatpush.bf16.msra.mxu0 %v2614_v61  ;;  %v3987_v61 = vld [vmem:[%s5972_s5 + $0x6e0] sm:$0xf0] }
  0x51   :  { %647 = vmatpush.bf16.msra.mxu1 %v2742_v0  ;;  %v3931_v0 = vld [vmem:[%s5972_s5 + $0x520] sm:$0xf0]  ;;  %v3662_v10 = vor.u32 %v3987_v61, %v3661_v60  ;;  %v3521_v61 = vld [vmem:[%s5972_s5 + $0x5b0] sm:$0xf] }
  0x54   :  { %635 = vmatpush.bf16.msra.mxu0 %v2598_v9  ;;  %v3812_v9 = vld [vmem:[%s5972_s5 + $0x168] sm:$0xf0] }
  0x55   :  { %648 = vmatpush.bf16.msra.mxu1 %v2726_v12  ;;  %v3438_v12 = vor.u32 %v3931_v0, %v3437_v63  ;;  %v3952_v63 = vld [vmem:[%s5972_s5 + $0x5c8] sm:$0xf0]  ;;  %v3297_v0 = vld [vmem:[%s5972_s5 + $0x3f0] sm:$0xf] }
  0x58   :  { %636 = vmatpush.bf16.msra.mxu0 %v2582_v21  ;;  %v2962_v21 = vor.u32 %v3812_v9, %v2961_v8  ;;  %v3522_v8 = vor.u32 %v3952_v63, %v3521_v61  ;;  %v3493_v9 = vld [vmem:[%s5972_s5 + $0x578] sm:$0xf]  ;;  %v3635_v61 = vld [vmem:[%s5972_s5 + $0x6ac] sm:$0xf0]  ;;  %v3882_v63 = vld [vmem:[%s5972_s5 + $0x398] sm:$0xf0] }
  0x59   :  { %649 = vmatpush.bf16.msra.mxu1 %v2710_v25  ;;  %v3605_v25 = vld [vmem:[%s5972_s5 + $0x658] sm:$0xf] }
  0x5a   :  { %v3606_v36 = vor.u32 %v3973_v27, %v3605_v25  ;;  %v2991_v25 = vld [vmem:[%s5972_s5 + $0x1a4] sm:$0xf0]  ;;  %v3938_v27 = vld [vmem:[%s5972_s5 + $0x558] sm:$0xf0] }
  0x5c   :  { %637 = vmatpush.bf16.msra.mxu0 %v2566_v34  ;;  %v2905_v34 = vld [vmem:[%s5972_s5 + $0xe0] sm:$0xf] }
  0x5d   :  { %650 = vmatpush.bf16.msra.mxu1 %v2694_v38  ;;  %v3382_v38 = vor.u32 %v3917_v29, %v3381_v28  ;;  %v2906_v45 = vor.u32 %v3798_v35, %v2905_v34  ;;  %v2794_v29 = vor.u32 %v3770_v20, %v2793_v19  ;;  %v3187_v35 = vld [vmem:[%s5972_s5 + $0x32c] sm:$0xf0]  ;;  %v3823_v20 = vld [vmem:[%s5972_s5 + $0x1c4] sm:$0xf] }
  0x60   :  { %638 = vmatpush.bf16.msra.mxu0 %v2550_v47  ;;  %v3791_v47 = vld [vmem:[%s5972_s5 + $0xc0] sm:$0xf0] }
  0x61   :  { %651 = vmatpush.bf16.msra.mxu1 %v2678_v48  ;;  %v3578_v48 = vor.u32 %v3966_v39, %v3577_v37  ;;  %v2878_v57 = vor.u32 %v3791_v47, %v2877_v46  ;;  %v2963_v37 = vld [vmem:[%s5972_s5 + $0x16c] sm:$0xf0]  ;;  %v3851_v47 = vld [vmem:[%s5972_s5 + $0x2a4] sm:$0xf] }
  0xa0   :  { %v138_v52 = vpop.f32.mrf.mxu0 }
  0xa1   :  { %v139_v53 = vadd.f32 %v138_v52, %v45_v50  ;;  %v151_v54 = vpop.f32.mrf.mxu1  ;;  %v3354_v50 = vor.u32 %v3910_v41, %v3353_v40  ;;  %v3325_v52 = vld [vmem:[%s5972_s5 + $0x428] sm:$0xf]  ;;  %v3858_v41 = vld [vmem:[%s5972_s5 + $0x2dc] sm:$0xf] }
  0xa2   :  { %v152_v58 = vadd.f32 %v151_v54, %v46_v51  ;;  %v3959_v51 = vld [vmem:[%s5972_s5 + $0x600] sm:$0xf0]  ;;  %v3102_v54 = vor.u32 %v3847_v44, %v3101_v43  ;;  %v3159_v43 = vld [vmem:[%s5972_s5 + $0x2f4] sm:$0xf0]  ;;  %v3802_v44 = vld [vmem:[%s5972_s5 + $0x11c] sm:$0xf] }
  0xa3   :  { %v155_v62 = vmax.f32 %v139_v53, 0.0  ;;  %v3903_v53 = vld [vmem:[%s5972_s5 + $0x440] sm:$0xf0]  ;;  %v3550_v60 = vor.u32 %v3959_v51, %v3549_v49  ;;  %v3162_v46 = vor.u32 %v3858_v41, %v3159_v43  ;;  %v3131_v49 = vld [vmem:[%s5972_s5 + $0x2bc] sm:$0xf0] }
  0xa4   :  { %v156_v1 = vmax.f32 %v152_v58, 0.0  ;;  %v2849_v58 = vld [vmem:[%s5972_s5 + $0x70] sm:$0xf]  ;;  %v2907_v51 = vld [vmem:[%s5972_s5 + $0xfc] sm:$0xf0] }
  0xa5   :  { %v4555_v2 = vpack.c.bf16 %v155_v62, %v155_v62  ;;  %v3326_v62 = vor.u32 %v3903_v53, %v3325_v52  ;;  %v2850_v5 = vor.u32 %v3784_v59, %v2849_v58  ;;  %v3134_v52 = vor.u32 %v3851_v47, %v3131_v49  ;;  %v3075_v58 = vld [vmem:[%s5972_s5 + $0x24c] sm:$0xf0]  ;;  %v3977_v59 = vld [vmem:[%s5972_s5 + $0x694] sm:$0xf]  ;;  %v3942_v47 = vld [vmem:[%s5972_s5 + $0x57c] sm:$0xf] }
  0xa6   :  { %v4563_v7 = vpack.c.bf16 %v156_v1, %v156_v1  ;;  %v3896_v1 = vld [vmem:[%s5972_s5 + $0x408] sm:$0xf0]  ;;  %v3949_v41 = vld [vmem:[%s5972_s5 + $0x5b4] sm:$0xf] }
  0xa7   :  { %561 = vmatmul.bf16.vlgmr.msra.gmra.mxu2 %v4555_v2  ;;  %587 = vmatmul.bf16.vlgmr.msrb.gmra.mxu0 %v4555_v2 }
  0xa8   :  { %574 = vmatmul.bf16.vlgmr.msra.gmra.mxu3 %v4563_v7  ;;  %600 = vmatmul.bf16.vlgmr.msrb.gmra.mxu1 %v4563_v7  ;;  %v140_v16 = vpop.f32.mrf.mxu0 }
  0xa9   :  { %v153_v17 = vpop.f32.mrf.mxu1  ;;  %2102 = vmatpush.bf16.msra.mxu3 %v3214_v3  ;;  %2089 = vmatpush.bf16.msra.mxu2 %v2990_v6  ;;  %v3074_v3 = vor.u32 %v3840_v56, %v3073_v55  ;;  %v2821_v6 = vld [vmem:[%s5972_s5 + $0x38] sm:$0xf]  ;;  %v3826_v16 = vld [vmem:[%s5972_s5 + $0x1d8] sm:$0xf0]  ;;  %v3103_v55 = vld [vmem:[%s5972_s5 + $0x284] sm:$0xf0] }
  0xaa   :  { %2128 = vmatpush.bf16.msrb.mxu1 %v3662_v10  ;;  %2115 = vmatpush.bf16.msrb.mxu0 %v3438_v12  ;;  %v3298_v10 = vor.u32 %v3896_v1, %v3297_v0  ;;  %v3269_v12 = vld [vmem:[%s5972_s5 + $0x3b8] sm:$0xf]  ;;  %v3018_v28 = vor.u32 %v3826_v16, %v3017_v15  ;;  %v3638_v0 = vor.u32 %v3977_v59, %v3635_v61  ;;  %v2851_v15 = vld [vmem:[%s5972_s5 + $0x8c] sm:$0xf0]  ;;  %v3921_v16 = vld [vmem:[%s5972_s5 + $0x4d4] sm:$0xf] }
  0xab   :  { %v3270_v22 = vor.u32 %v3889_v13, %v3269_v12  ;;  %v3607_v12 = vld [vmem:[%s5972_s5 + $0x674] sm:$0xf0]  ;;  %v4924_v59 = vld [vmem:[%s5973_s4] sm:$0xf] }
  0xac   :  { %v3243_v61 = vld [vmem:[%s5972_s5 + $0x39c] sm:$0xf0] }
  0xad   :  { %2103 = vmatpush.bf16.msra.mxu3 %v3186_v18  ;;  %2090 = vmatpush.bf16.msra.mxu2 %v2962_v21  ;;  %v3872_v18 = vld [vmem:[%s5972_s5 + $0x34c] sm:$0xf]  ;;  %v3494_v21 = vor.u32 %v3945_v11, %v3493_v9  ;;  %v3047_v9 = vld [vmem:[%s5972_s5 + $0x214] sm:$0xf0] }
  0xae   :  { %2129 = vmatpush.bf16.msrb.mxu1 %v3634_v24  ;;  %2116 = vmatpush.bf16.msrb.mxu0 %v3410_v26  ;;  %v3816_v24 = vld [vmem:[%s5972_s5 + $0x18c] sm:$0xf]  ;;  %v3465_v26 = vld [vmem:[%s5972_s5 + $0x540] sm:$0xf]  ;;  %v3218_v32 = vor.u32 %v3872_v18, %v3215_v23  ;;  %v3411_v18 = vld [vmem:[%s5972_s5 + $0x4ec] sm:$0xf0] }
  0xaf   :  { %v2994_v34 = vor.u32 %v3816_v24, %v2991_v25  ;;  %v3414_v19 = vor.u32 %v3921_v16, %v3411_v18  ;;  %v3963_v23 = vld [vmem:[%s5972_s5 + $0x624] sm:$0xf]  ;;  %v3579_v24 = vld [vmem:[%s5972_s5 + $0x63c] sm:$0xf0]  ;;  %v2997_v18 = vld [vmem:[%s5972_s5 + $0x190] sm:$0xf] }
  0xb0   :  { %v3582_v25 = vor.u32 %v3963_v23, %v3579_v24  ;;  %v3862_v23 = vld [vmem:[%s5972_s5 + $0x2f8] sm:$0xf0] }
  0xb1   :  { %2104 = vmatpush.bf16.msra.mxu3 %v3158_v30  ;;  %2091 = vmatpush.bf16.msra.mxu2 %v2934_v33  ;;  %v3984_v30 = vld [vmem:[%s5972_s5 + $0x6cc] sm:$0xf]  ;;  %v3865_v33 = vld [vmem:[%s5972_s5 + $0x314] sm:$0xf] }
  0xb2   :  { %2130 = vmatpush.bf16.msrb.mxu1 %v3606_v36  ;;  %2117 = vmatpush.bf16.msrb.mxu0 %v3382_v38  ;;  %v3809_v36 = vld [vmem:[%s5972_s5 + $0x154] sm:$0xf]  ;;  %v3466_v38 = vor.u32 %v3938_v27, %v3465_v26  ;;  %v3666_v39 = vor.u32 %v3984_v30, %v3663_v31  ;;  %v3190_v40 = vor.u32 %v3865_v33, %v3187_v35  ;;  %v3774_v26 = vld [vmem:[%s5972_s5 + $0x3c] sm:$0xf]  ;;  %v2823_v27 = vld [vmem:[%s5972_s5 + $0x54] sm:$0xf0] }
  0xb3   :  { %v3383_v30 = vld [vmem:[%s5972_s5 + $0x4b4] sm:$0xf0]  ;;  %v3551_v33 = vld [vmem:[%s5972_s5 + $0x604] sm:$0xf0]  ;;  %v3767_v35 = vld [vmem:[%s5972_s5 + $0x4] sm:$0xf] }
  0xb5   :  { %2105 = vmatpush.bf16.msra.mxu3 %v3130_v42  ;;  %2092 = vmatpush.bf16.msra.mxu2 %v2906_v45  ;;  %v2966_v42 = vor.u32 %v3809_v36, %v2963_v37  ;;  %v2935_v45 = vld [vmem:[%s5972_s5 + $0x134] sm:$0xf0]  ;;  %v2795_v36 = vld [vmem:[%s5972_s5 + $0x1c] sm:$0xf0]  ;;  %v3907_v37 = vld [vmem:[%s5972_s5 + $0x464] sm:$0xf] }
  0xb6   :  { %2131 = vmatpush.bf16.msrb.mxu1 %v3578_v48  ;;  %2118 = vmatpush.bf16.msrb.mxu0 %v3354_v50  ;;  %v2938_v48 = vor.u32 %v3802_v44, %v2935_v45  ;;  %v3795_v50 = vld [vmem:[%s5972_s5 + $0xe4] sm:$0xf]  ;;  %v3900_v44 = vld [vmem:[%s5972_s5 + $0x42c] sm:$0xf]  ;;  %v3327_v45 = vld [vmem:[%s5972_s5 + $0x444] sm:$0xf0] }
  0xb7   :  { %613 = vmatmul.bf16.vlgmr.msrb.gmra.mxu2 %v4555_v2  ;;  %639 = vmatmul.bf16.vlgmr.msra.gmra.mxu0 %v4555_v2  ;;  %v3045_v2 = vld [vmem:[%s5972_s5 + $0x1f8] sm:$0xf]  ;;  %v2910_v53 = vor.u32 %v3795_v50, %v2907_v51  ;;  %v3893_v50 = vld [vmem:[%s5972_s5 + $0x3f4] sm:$0xf]  ;;  %v3299_v51 = vld [vmem:[%s5972_s5 + $0x40c] sm:$0xf0] }
  0xb8   :  { %626 = vmatmul.bf16.vlgmr.msrb.gmra.mxu3 %v4563_v7  ;;  %652 = vmatmul.bf16.vlgmr.msra.gmra.mxu1 %v4563_v7  ;;  %v3777_v7 = vld [vmem:[%s5972_s5 + $0x50] sm:$0xf0]  ;;  %v3046_v14 = vor.u32 %v3833_v4, %v3045_v2  ;;  %v2879_v2 = vld [vmem:[%s5972_s5 + $0xc4] sm:$0xf0]  ;;  %v3928_v4 = vld [vmem:[%s5972_s5 + $0x50c] sm:$0xf] }
  0xb9   :  { %2106 = vmatpush.bf16.msra.mxu3 %v3102_v54  ;;  %2093 = vmatpush.bf16.msra.mxu2 %v2878_v57  ;;  %v2822_v17 = vor.u32 %v3777_v7, %v2821_v6  ;;  %v3844_v54 = vld [vmem:[%s5972_s5 + $0x26c] sm:$0xf]  ;;  %v3837_v57 = vld [vmem:[%s5972_s5 + $0x234] sm:$0xf]  ;;  %v3439_v6 = vld [vmem:[%s5972_s5 + $0x524] sm:$0xf0] }
  0xba   :  { %2132 = vmatpush.bf16.msrb.mxu1 %v3550_v60  ;;  %2119 = vmatpush.bf16.msrb.mxu0 %v3326_v62  ;;  %v3106_v56 = vor.u32 %v3844_v54, %v3103_v55  ;;  %v3078_v60 = vor.u32 %v3837_v57, %v3075_v58  ;;  %v3241_v62 = vld [vmem:[%s5972_s5 + $0x380] sm:$0xf]  ;;  %v3442_v7 = vor.u32 %v3928_v4, %v3439_v6  ;;  %v3271_v57 = vld [vmem:[%s5972_s5 + $0x3d4] sm:$0xf0]  ;;  %v225_v4 = vperm.slane %v4924_v59, 0 }
  0xbb   :  { %v3242_v1 = vor.u32 %v3882_v63, %v3241_v62  ;;  %v3467_v54 = vld [vmem:[%s5972_s5 + $0x55c] sm:$0xf0]  ;;  %v226_v62 = vperm.slane %v4924_v59, 1  ;;  %v3876_v6 = vld [vmem:[%s5972_s5 + $0x368] sm:$0xf0] }
  0xbd   :  { %2107 = vmatpush.bf16.msra.mxu3 %v3074_v3  ;;  %2094 = vmatpush.bf16.msra.mxu2 %v2850_v5  ;;  %v3788_v3 = vld [vmem:[%s5972_s5 + $0xac] sm:$0xf] }
  0xbe   :  { %2133 = vmatpush.bf16.msrb.mxu1 %v3522_v8  ;;  %2120 = vmatpush.bf16.msrb.mxu0 %v3298_v10  ;;  %v2882_v5 = vor.u32 %v3788_v3, %v2879_v2  ;;  %v3830_v8 = vld [vmem:[%s5972_s5 + $0x1fc] sm:$0xf] }
  0xbf   :  { %v3970_v10 = vld [vmem:[%s5972_s5 + $0x65c] sm:$0xf]  ;;  %v3050_v11 = vor.u32 %v3830_v8, %v3047_v9 }
  0xc0   :  { %v3610_v13 = vor.u32 %v3970_v10, %v3607_v12 }
  0xc1   :  { %2108 = vmatpush.bf16.msra.mxu3 %v3046_v14  ;;  %2095 = vmatpush.bf16.msra.mxu2 %v2822_v17  ;;  %v3781_v14 = vld [vmem:[%s5972_s5 + $0x74] sm:$0xf] }
  0xc2   :  { %2134 = vmatpush.bf16.msrb.mxu1 %v3494_v21  ;;  %2121 = vmatpush.bf16.msrb.mxu0 %v3270_v22  ;;  %v2854_v17 = vor.u32 %v3781_v14, %v2851_v15  ;;  %v3019_v21 = vld [vmem:[%s5972_s5 + $0x1dc] sm:$0xf0]  ;;  %v3869_v14 = vld [vmem:[%s5972_s5 + $0x330] sm:$0xf0] }
  0xc3   :  { %v3022_v22 = vor.u32 %v3823_v20, %v3019_v21 }
  0xc5   :  { %2109 = vmatpush.bf16.msra.mxu3 %v3018_v28  ;;  %2096 = vmatpush.bf16.msra.mxu2 %v2794_v29  ;;  %v2826_v28 = vor.u32 %v3774_v26, %v2823_v27  ;;  %v3914_v29 = vld [vmem:[%s5972_s5 + $0x49c] sm:$0xf]  ;;  %v228_v26 = vperm.slane %v4924_v59, 3  ;;  %v2969_v27 = vld [vmem:[%s5972_s5 + $0x158] sm:$0xf] }
  0xc6   :  { %2135 = vmatpush.bf16.msrb.mxu1 %v3466_v38  ;;  %2122 = vmatpush.bf16.msrb.mxu0 %v3242_v1  ;;  %v3386_v31 = vor.u32 %v3914_v29, %v3383_v30  ;;  %v2798_v38 = vor.u32 %v3767_v35, %v2795_v36 }
  0xc9   :  { %2154 = vmatpush.bf16.msrb.mxu3 %v3218_v32  ;;  %2141 = vmatpush.bf16.msrb.mxu2 %v2994_v34  ;;  %v3956_v32 = vld [vmem:[%s5972_s5 + $0x5ec] sm:$0xf] }
  0xca   :  { %2180 = vmatpush.bf16.msra.mxu1 %v3666_v39  ;;  %2167 = vmatpush.bf16.msra.mxu0 %v3442_v7  ;;  %v3554_v34 = vor.u32 %v3956_v32, %v3551_v33  ;;  %v3355_v39 = vld [vmem:[%s5972_s5 + $0x47c] sm:$0xf0]  ;;  %v3137_v32 = vld [vmem:[%s5972_s5 + $0x2a8] sm:$0xf]  ;;  %v3855_v33 = vld [vmem:[%s5972_s5 + $0x2c0] sm:$0xf0] }
  0xcd   :  { %2155 = vmatpush.bf16.msrb.mxu3 %v3190_v40  ;;  %2142 = vmatpush.bf16.msrb.mxu2 %v2966_v42  ;;  %v3358_v40 = vor.u32 %v3907_v37, %v3355_v39  ;;  %v3523_v42 = vld [vmem:[%s5972_s5 + $0x5cc] sm:$0xf0]  ;;  %v3806_v39 = vld [vmem:[%s5972_s5 + $0x138] sm:$0xf0] }
  0xce   :  { %2181 = vmatpush.bf16.msra.mxu1 %v3638_v0  ;;  %2168 = vmatpush.bf16.msra.mxu0 %v3414_v19  ;;  %v3526_v43 = vor.u32 %v3949_v41, %v3523_v42  ;;  %v3820_v19 = vld [vmem:[%s5972_s5 + $0x1a8] sm:$0xf0]  ;;  %v227_v41 = vperm.slane %v4924_v59, 2  ;;  %v3109_v42 = vld [vmem:[%s5972_s5 + $0x270] sm:$0xf] }
  0xcf   :  { %v2998_v24 = vor.u32 %v3820_v19, %v2997_v18  ;;  %v3641_v59 = vld [vmem:[%s5972_s5 + $0x698] sm:$0xf]  ;;  %v3925_v19 = vld [vmem:[%s5972_s5 + $0x4f0] sm:$0xf0] }
  0xd0   :  { %v3417_v18 = vld [vmem:[%s5972_s5 + $0x4d8] sm:$0xf] }
  0xd1   :  { %2156 = vmatpush.bf16.msrb.mxu3 %v3162_v46  ;;  %2143 = vmatpush.bf16.msrb.mxu2 %v2938_v48  ;;  %v3330_v46 = vor.u32 %v3900_v44, %v3327_v45  ;;  %v3495_v48 = vld [vmem:[%s5972_s5 + $0x594] sm:$0xf0]  ;;  %v3848_v44 = vld [vmem:[%s5972_s5 + $0x288] sm:$0xf0]  ;;  %v3669_v45 = vld [vmem:[%s5972_s5 + $0x6d0] sm:$0xf] }
  0xd2   :  { %2182 = vmatpush.bf16.msra.mxu1 %v3610_v13  ;;  %2169 = vmatpush.bf16.msra.mxu0 %v3386_v31  ;;  %v3498_v49 = vor.u32 %v3942_v47, %v3495_v48  ;;  %v3193_v13 = vld [vmem:[%s5972_s5 + $0x318] sm:$0xf] }
  0xd3   :  { %v3194_v20 = vor.u32 %v3869_v14, %v3193_v13 }
  0xd5   :  { %2157 = vmatpush.bf16.msrb.mxu3 %v3134_v52  ;;  %2144 = vmatpush.bf16.msrb.mxu2 %v2910_v53  ;;  %v3302_v52 = vor.u32 %v3893_v50, %v3299_v51  ;;  %v3935_v53 = vld [vmem:[%s5972_s5 + $0x544] sm:$0xf] }
  0xd6   :  { %2183 = vmatpush.bf16.msra.mxu1 %v3582_v25  ;;  %2170 = vmatpush.bf16.msra.mxu0 %v3358_v40  ;;  %v3470_v55 = vor.u32 %v3935_v53, %v3467_v54  ;;  %v3138_v40 = vor.u32 %v3855_v33, %v3137_v32  ;;  %v3799_v50 = vld [vmem:[%s5972_s5 + $0x100] sm:$0xf0]  ;;  %v3081_v54 = vld [vmem:[%s5972_s5 + $0x238] sm:$0xf]  ;;  %v3223_v32 = vld [vmem:[%s5972_s5 + $0x36c] sm:$0xf0] }
  0xd7   :  { %v2829_v33 = vld [vmem:[%s5972_s5 + $0x40] sm:$0xf] }
  0xd9   :  { %2158 = vmatpush.bf16.msrb.mxu3 %v3106_v56  ;;  %2145 = vmatpush.bf16.msrb.mxu2 %v2882_v5  ;;  %v3886_v56 = vld [vmem:[%s5972_s5 + $0x3bc] sm:$0xf]  ;;  %v3221_v5 = vld [vmem:[%s5972_s5 + $0x350] sm:$0xf] }
  0xda   :  { %2184 = vmatpush.bf16.msra.mxu1 %v3554_v34  ;;  %2171 = vmatpush.bf16.msra.mxu0 %v3330_v46  ;;  %v3274_v58 = vor.u32 %v3886_v56, %v3271_v57  ;;  %v3222_v9 = vor.u32 %v3876_v6, %v3221_v5  ;;  %v3988_v46 = vld [vmem:[%s5972_s5 + $0x6e8] sm:$0xf0] }
  0xdb   :  { %v3670_v53 = vor.u32 %v3988_v46, %v3669_v45  ;;  %v3195_v45 = vld [vmem:[%s5972_s5 + $0x334] sm:$0xf0]  ;;  %v2801_v46 = vld [vmem:[%s5972_s5 + $0x8] sm:$0xf] }
  0xdd   :  { %2159 = vmatpush.bf16.msrb.mxu3 %v3078_v60  ;;  %2146 = vmatpush.bf16.msrb.mxu2 %v2854_v17  ;;  %v3879_v60 = vld [vmem:[%s5972_s5 + $0x384] sm:$0xf] }
  0xde   :  { %2185 = vmatpush.bf16.msra.mxu1 %v3526_v43  ;;  %2172 = vmatpush.bf16.msra.mxu0 %v3302_v52  ;;  %v3246_v63 = vor.u32 %v3879_v60, %v3243_v61  ;;  %v3110_v52 = vor.u32 %v3848_v44, %v3109_v42  ;;  %v3981_v60 = vld [vmem:[%s5972_s5 + $0x6b0] sm:$0xf0]  ;;  %v3866_v44 = vld [vmem:[%s5972_s5 + $0x31c] sm:$0xf] }
  0xdf   :  { %v3642_v6 = vor.u32 %v3981_v60, %v3641_v59  ;;  %v3859_v59 = vld [vmem:[%s5972_s5 + $0x2e4] sm:$0xf]  ;;  %v3167_v60 = vld [vmem:[%s5972_s5 + $0x2fc] sm:$0xf0] }
  0xe1   :  { %2160 = vmatpush.bf16.msrb.mxu3 %v3050_v11  ;;  %2147 = vmatpush.bf16.msrb.mxu2 %v2826_v28  ;;  %v3813_v28 = vld [vmem:[%s5972_s5 + $0x170] sm:$0xf0] }
  0xe2   :  { %2186 = vmatpush.bf16.msra.mxu1 %v3498_v49  ;;  %2173 = vmatpush.bf16.msra.mxu0 %v3274_v58  ;;  %v2970_v35 = vor.u32 %v3813_v28, %v2969_v27  ;;  %v2913_v49 = vld [vmem:[%s5972_s5 + $0xe8] sm:$0xf]  ;;  %v3841_v58 = vld [vmem:[%s5972_s5 + $0x250] sm:$0xf0]  ;;  %v3967_v28 = vld [vmem:[%s5972_s5 + $0x640] sm:$0xf0] }
  0xe3   :  { %v3082_v5 = vor.u32 %v3841_v58, %v3081_v54  ;;  %v3585_v27 = vld [vmem:[%s5972_s5 + $0x628] sm:$0xf]  ;;  %v3529_v54 = vld [vmem:[%s5972_s5 + $0x5b8] sm:$0xf] }
  0xe5   :  { %2161 = vmatpush.bf16.msrb.mxu3 %v3022_v22  ;;  %2148 = vmatpush.bf16.msrb.mxu2 %v2798_v38  ;;  %v3165_v22 = vld [vmem:[%s5972_s5 + $0x2e0] sm:$0xf] }
  0xe6   :  { %2187 = vmatpush.bf16.msra.mxu1 %v3470_v55  ;;  %2174 = vmatpush.bf16.msra.mxu0 %v3246_v63  ;;  %v3166_v30 = vor.u32 %v3862_v23, %v3165_v22  ;;  %v2941_v38 = vld [vmem:[%s5972_s5 + $0x120] sm:$0xf]  ;;  %v2885_v63 = vld [vmem:[%s5972_s5 + $0xb0] sm:$0xf]  ;;  %v3025_v23 = vld [vmem:[%s5972_s5 + $0x1c8] sm:$0xf] }
  0xe7   :  { %v2942_v47 = vor.u32 %v3806_v39, %v2941_v38  ;;  %v3586_v38 = vor.u32 %v3967_v28, %v3585_v27  ;;  %v3277_v27 = vld [vmem:[%s5972_s5 + $0x3c0] sm:$0xf]  ;;  %v3890_v28 = vld [vmem:[%s5972_s5 + $0x3d8] sm:$0xf0] }
 0x124   :  { %v588_v0 = vpop.f32.mrf.mxu0 }
 0x125   :  { %v589_v1 = vadd.f32 %v588_v0, %v226_v62  ;;  %v601_v3 = vpop.f32.mrf.mxu1  ;;  %v2914_v62 = vor.u32 %v3799_v50, %v2913_v49  ;;  %v3911_v49 = vld [vmem:[%s5972_s5 + $0x480] sm:$0xf0] }
 0x127   :  { %v602_v2 = vadd.f32 %v601_v3, %v589_v1  ;;  %v3792_v3 = vld [vmem:[%s5972_s5 + $0xc8] sm:$0xf0] }
 0x128   :  { %v2886_v13 = vor.u32 %v3792_v3, %v2885_v63  ;;  %v3904_v63 = vld [vmem:[%s5972_s5 + $0x448] sm:$0xf0]  ;;  %v2971_v3 = vld [vmem:[%s5972_s5 + $0x174] sm:$0xf0] }
 0x129   :  { %v658_v7 = vmax.f32 %v602_v2, 0.0  ;;  %v3445_v2 = vld [vmem:[%s5972_s5 + $0x510] sm:$0xf] }
 0x12a   :  { %v562_v8 = vpop.f32.mrf.mxu2 }
 0x12b   :  { %v4940_v10 = vpack.c.bf16 %v658_v7, %v658_v7  ;;  %v563_v11 = vadd.f32 %v562_v8, %v225_v4  ;;  %v575_v12 = vpop.f32.mrf.mxu3  ;;  %v3932_v4 = vld [vmem:[%s5972_s5 + $0x528] sm:$0xf0]  ;;  %v3053_v7 = vld [vmem:[%s5972_s5 + $0x200] sm:$0xf]  ;;  %v3834_v8 = vld [vmem:[%s5972_s5 + $0x218] sm:$0xf0] }
 0x12c   :  { %v590_v15 = vpop.f32.mrf.mxu0  ;;  %v3446_v14 = vor.u32 %v3932_v4, %v3445_v2  ;;  %v3170_v2 = vor.u32 %v3859_v59, %v3167_v60  ;;  %v3501_v4 = vld [vmem:[%s5972_s5 + $0x580] sm:$0xf]  ;;  %v3419_v59 = vld [vmem:[%s5972_s5 + $0x4f4] sm:$0xf0] }
 0x12d   :  { %v576_v16 = vadd.f32 %v575_v12, %v563_v11  ;;  %v603_v17 = vpop.f32.mrf.mxu1  ;;  %2110 = vmatmul.bf16.vlgmr.msra.gmra.mxu3 %v4940_v10  ;;  %v3613_v11 = vld [vmem:[%s5972_s5 + $0x660] sm:$0xf]  ;;  %v3974_v12 = vld [vmem:[%s5972_s5 + $0x678] sm:$0xf0]  ;;  %v2857_v15 = vld [vmem:[%s5972_s5 + $0x78] sm:$0xf] }
 0x12e   :  { %2206 = vmatpush.bf16.msra.mxu3 %v3222_v9  ;;  %v3785_v17 = vld [vmem:[%s5972_s5 + $0x90] sm:$0xf0]  ;;  %v3614_v22 = vor.u32 %v3974_v12, %v3613_v11  ;;  %v3305_v11 = vld [vmem:[%s5972_s5 + $0x3f8] sm:$0xf] }
 0x12f   :  { %v657_v21 = vmax.f32 %v576_v16, 0.0  ;;  %v3897_v12 = vld [vmem:[%s5972_s5 + $0x410] sm:$0xf0] }
 0x131   :  { %v4961_v25 = vpack.c.bf16 %v657_v21, %v657_v21  ;;  %v3054_v21 = vor.u32 %v3834_v8, %v3053_v7  ;;  %v3852_v7 = vld [vmem:[%s5972_s5 + $0x2ac] sm:$0xf]  ;;  %v3139_v8 = vld [vmem:[%s5972_s5 + $0x2c4] sm:$0xf0] }
 0x132   :  { %2207 = vmatpush.bf16.msra.mxu3 %v3194_v20  ;;  %v564_v29 = vpop.f32.mrf.mxu2 }
 0x133   :  { %v577_v31 = vpop.f32.mrf.mxu3  ;;  %2097 = vmatmul.bf16.vlgmr.msra.gmra.mxu2 %v4961_v25  ;;  %v2858_v29 = vor.u32 %v3785_v17, %v2857_v15  ;;  %v2943_v15 = vld [vmem:[%s5972_s5 + $0x13c] sm:$0xf0]  ;;  %v3142_v17 = vor.u32 %v3852_v7, %v3139_v8  ;;  %v3915_v8 = vld [vmem:[%s5972_s5 + $0x4a4] sm:$0xf] }
 0x134   :  { %2193 = vmatpush.bf16.msra.mxu2 %v2998_v24  ;;  %v640_v34 = vpop.f32.mrf.mxu0  ;;  %v3873_v31 = vld [vmem:[%s5972_s5 + $0x354] sm:$0xf]  ;;  %v2831_v7 = vld [vmem:[%s5972_s5 + $0x5c] sm:$0xf0] }
 0x135   :  { %v641_v36 = vadd.f32 %v640_v34, %v228_v26  ;;  %v653_v37 = vpop.f32.mrf.mxu1  ;;  %v3827_v26 = vld [vmem:[%s5972_s5 + $0x1e0] sm:$0xf0]  ;;  %v3778_v34 = vld [vmem:[%s5972_s5 + $0x58] sm:$0xf0]  ;;  %v3226_v39 = vor.u32 %v3873_v31, %v3223_v32  ;;  %v2915_v31 = vld [vmem:[%s5972_s5 + $0x104] sm:$0xf0] }
 0x136   :  { %2208 = vmatpush.bf16.msra.mxu3 %v3166_v30  ;;  %v3418_v30 = vor.u32 %v3925_v19, %v3417_v18  ;;  %v2830_v42 = vor.u32 %v3778_v34, %v2829_v33  ;;  %v3473_v18 = vld [vmem:[%s5972_s5 + $0x548] sm:$0xf]  ;;  %v3939_v19 = vld [vmem:[%s5972_s5 + $0x560] sm:$0xf0]  ;;  %v3838_v34 = vld [vmem:[%s5972_s5 + $0x23c] sm:$0xf] }
 0x137   :  { %v654_v43 = vadd.f32 %v653_v37, %v641_v36  ;;  %v3918_v36 = vld [vmem:[%s5972_s5 + $0x4b8] sm:$0xf0]  ;;  %v3026_v37 = vor.u32 %v3827_v26, %v3025_v23  ;;  %v3985_v23 = vld [vmem:[%s5972_s5 + $0x6d4] sm:$0xf] }
 0x138   :  { %2194 = vmatpush.bf16.msra.mxu2 %v2970_v35  ;;  %v3389_v35 = vld [vmem:[%s5972_s5 + $0x4a0] sm:$0xf] }
 0x139   :  { %v660_v48 = vmax.f32 %v654_v43, 0.0  ;;  %v3390_v43 = vor.u32 %v3918_v36, %v3389_v35  ;;  %v3278_v35 = vor.u32 %v3890_v28, %v3277_v27  ;;  %v3083_v36 = vld [vmem:[%s5972_s5 + $0x254] sm:$0xf0]  ;;  %v3821_v28 = vld [vmem:[%s5972_s5 + $0x1b0] sm:$0xf0] }
 0x13a   :  { %2209 = vmatpush.bf16.msra.mxu3 %v3138_v40  ;;  %v614_v51 = vpop.f32.mrf.mxu2  ;;  %v3557_v40 = vld [vmem:[%s5972_s5 + $0x5f0] sm:$0xf]  ;;  %v3005_v27 = vld [vmem:[%s5972_s5 + $0x198] sm:$0xf] }
 0x13b   :  { %v5005_v55 = vpack.c.bf16 %v660_v48, %v660_v48  ;;  %v615_v56 = vadd.f32 %v614_v51, %v227_v41  ;;  %v627_v57 = vpop.f32.mrf.mxu3  ;;  %v3960_v41 = vld [vmem:[%s5972_s5 + $0x608] sm:$0xf0]  ;;  %v3361_v48 = vld [vmem:[%s5972_s5 + $0x468] sm:$0xf]  ;;  %v3817_v51 = vld [vmem:[%s5972_s5 + $0x194] sm:$0xf] }
 0x13c   :  { %2195 = vmatpush.bf16.msra.mxu2 %v2942_v47  ;;  %v642_v61 = vpop.f32.mrf.mxu0  ;;  %v3771_v47 = vld [vmem:[%s5972_s5 + $0x20] sm:$0xf0]  ;;  %v3558_v50 = vor.u32 %v3960_v41, %v3557_v40  ;;  %v3362_v58 = vor.u32 %v3911_v49, %v3361_v48  ;;  %v3249_v40 = vld [vmem:[%s5972_s5 + $0x388] sm:$0xf] }
 0x13d   :  { %v628_v0 = vadd.f32 %v627_v57, %v615_v56  ;;  %v655_v1 = vpop.f32.mrf.mxu1  ;;  %2136 = vmatmul.bf16.vlgmr.msrb.gmra.mxu1 %v5005_v55  ;;  %2162 = vmatmul.bf16.vlgmr.msrb.gmra.mxu3 %v4940_v10  ;;  %v3953_v56 = vld [vmem:[%s5972_s5 + $0x5d0] sm:$0xf0]  ;;  %v2802_v57 = vor.u32 %v3771_v47, %v2801_v46  ;;  %v3883_v41 = vld [vmem:[%s5972_s5 + $0x3a0] sm:$0xf0]  ;;  %v3086_v46 = vor.u32 %v3838_v34, %v3083_v36  ;;  %v3173_v34 = vld [vmem:[%s5972_s5 + $0x2e8] sm:$0xf] }
 0x13e   :  { %2210 = vmatpush.bf16.msra.mxu3 %v3110_v52  ;;  %2232 = vmatpush.bf16.msrb.mxu1 %v3670_v53  ;;  %v2999_v52 = vld [vmem:[%s5972_s5 + $0x1ac] sm:$0xf0]  ;;  %v3198_v53 = vor.u32 %v3866_v44, %v3195_v45  ;;  %v3810_v1 = vld [vmem:[%s5972_s5 + $0x15c] sm:$0xf]  ;;  %v3929_v44 = vld [vmem:[%s5972_s5 + $0x514] sm:$0xf]  ;;  %v3250_v49 = vor.u32 %v3883_v41, %v3249_v40  ;;  %v3006_v36 = vor.u32 %v3821_v28, %v3005_v27 }
 0x13f   :  { %v659_v9 = vmax.f32 %v628_v0, 0.0  ;;  %v3002_v61 = vor.u32 %v3817_v51, %v2999_v52  ;;  %v3530_v0 = vor.u32 %v3953_v56, %v3529_v54  ;;  %v3447_v45 = vld [vmem:[%s5972_s5 + $0x52c] sm:$0xf0]  ;;  %v3831_v48 = vld [vmem:[%s5972_s5 + $0x204] sm:$0xf] }
 0x140   :  { %2196 = vmatpush.bf16.msra.mxu2 %v2914_v62  ;;  %v3333_v62 = vld [vmem:[%s5972_s5 + $0x430] sm:$0xf]  ;;  %v3971_v51 = vld [vmem:[%s5972_s5 + $0x664] sm:$0xf]  ;;  %v3615_v52 = vld [vmem:[%s5972_s5 + $0x67c] sm:$0xf0]  ;;  %v3450_v54 = vor.u32 %v3929_v44, %v3447_v45 }
 0x141   :  { %v5045_v16 = vpack.c.bf16 %v659_v9, %v659_v9  ;;  %v2974_v9 = vor.u32 %v3810_v1, %v2971_v3  ;;  %v3782_v56 = vld [vmem:[%s5972_s5 + $0x7c] sm:$0xf]  ;;  %v3587_v1 = vld [vmem:[%s5972_s5 + $0x644] sm:$0xf0]  ;;  %v2977_v40 = vld [vmem:[%s5972_s5 + $0x160] sm:$0xf] }
 0x142   :  { %2211 = vmatpush.bf16.msra.mxu3 %v3082_v5  ;;  %2233 = vmatpush.bf16.msrb.mxu1 %v3642_v6  ;;  %v616_v20 = vpop.f32.mrf.mxu2  ;;  %v3946_v5 = vld [vmem:[%s5972_s5 + $0x598] sm:$0xf0]  ;;  %v3334_v6 = vor.u32 %v3904_v63, %v3333_v62  ;;  %v3824_v62 = vld [vmem:[%s5972_s5 + $0x1cc] sm:$0xf]  ;;  %v3027_v63 = vld [vmem:[%s5972_s5 + $0x1e4] sm:$0xf0] }
 0x143   :  { %v629_v24 = vpop.f32.mrf.mxu3  ;;  %2123 = vmatmul.bf16.vlgmr.msrb.gmra.mxu0 %v5045_v16  ;;  %2149 = vmatmul.bf16.vlgmr.msrb.gmra.mxu2 %v4961_v25  ;;  %v3845_v20 = vld [vmem:[%s5972_s5 + $0x274] sm:$0xf]  ;;  %v3814_v41 = vld [vmem:[%s5972_s5 + $0x178] sm:$0xf0]  ;;  %v3503_v44 = vld [vmem:[%s5972_s5 + $0x59c] sm:$0xf0] }
 0x144   :  { %2197 = vmatpush.bf16.msra.mxu2 %v2886_v13  ;;  %2219 = vmatpush.bf16.msrb.mxu0 %v3446_v14  ;;  %v3502_v13 = vor.u32 %v3946_v5, %v3501_v4  ;;  %v3803_v14 = vld [vmem:[%s5972_s5 + $0x124] sm:$0xf]  ;;  %v3671_v24 = vld [vmem:[%s5972_s5 + $0x6ec] sm:$0xf0]  ;;  %v3229_v4 = vld [vmem:[%s5972_s5 + $0x358] sm:$0xf] }
 0x145   :  { %v2946_v26 = vor.u32 %v3803_v14, %v2943_v15  ;;  %v3674_v33 = vor.u32 %v3985_v23, %v3671_v24  ;;  %v3877_v5 = vld [vmem:[%s5972_s5 + $0x370] sm:$0xf0]  ;;  %v3559_v15 = vld [vmem:[%s5972_s5 + $0x60c] sm:$0xf0]  ;;  %v3908_v23 = vld [vmem:[%s5972_s5 + $0x46c] sm:$0xf] }
 0x146   :  { %2212 = vmatpush.bf16.msra.mxu3 %v3054_v21  ;;  %2234 = vmatpush.bf16.msrb.mxu1 %v3614_v22  ;;  %v3306_v21 = vor.u32 %v3897_v12, %v3305_v11  ;;  %v3111_v22 = vld [vmem:[%s5972_s5 + $0x28c] sm:$0xf0]  ;;  %v3030_v11 = vor.u32 %v3824_v62, %v3027_v63  ;;  %v3957_v14 = vld [vmem:[%s5972_s5 + $0x5f4] sm:$0xf]  ;;  %v3363_v24 = vld [vmem:[%s5972_s5 + $0x484] sm:$0xf0] }
 0x147   :  { %v3114_v32 = vor.u32 %v3845_v20, %v3111_v22  ;;  %v3870_v20 = vld [vmem:[%s5972_s5 + $0x338] sm:$0xf0]  ;;  %v2803_v22 = vld [vmem:[%s5972_s5 + $0x24] sm:$0xf0]  ;;  %v3989_v62 = vld [vmem:[%s5972_s5 + $0x6f0] sm:$0xf0] }
 0x148   :  { %2198 = vmatpush.bf16.msra.mxu2 %v2858_v29  ;;  %2220 = vmatpush.bf16.msrb.mxu0 %v3418_v30  ;;  %v3474_v29 = vor.u32 %v3939_v19, %v3473_v18  ;;  %v3796_v30 = vld [vmem:[%s5972_s5 + $0xec] sm:$0xf]  ;;  %v3201_v19 = vld [vmem:[%s5972_s5 + $0x320] sm:$0xf] }
 0x14a   :  { %2213 = vmatpush.bf16.msra.mxu3 %v3026_v37  ;;  %2235 = vmatpush.bf16.msrb.mxu1 %v3586_v38  ;;  %v3978_v37 = vld [vmem:[%s5972_s5 + $0x69c] sm:$0xf]  ;;  %v3643_v38 = vld [vmem:[%s5972_s5 + $0x6b4] sm:$0xf0] }
 0x14b   :  { %v3646_v47 = vor.u32 %v3978_v37, %v3643_v38  ;;  %v3901_v37 = vld [vmem:[%s5972_s5 + $0x434] sm:$0xf]  ;;  %v3335_v38 = vld [vmem:[%s5972_s5 + $0x44c] sm:$0xf0] }
 0x14c   :  { %2199 = vmatpush.bf16.msra.mxu2 %v2830_v42  ;;  %2221 = vmatpush.bf16.msrb.mxu0 %v3390_v43  ;;  %v3789_v42 = vld [vmem:[%s5972_s5 + $0xb4] sm:$0xf]  ;;  %v2887_v43 = vld [vmem:[%s5972_s5 + $0xcc] sm:$0xf0]  ;;  %v3338_v45 = vor.u32 %v3901_v37, %v3335_v38  ;;  %v3828_v38 = vld [vmem:[%s5972_s5 + $0x1e8] sm:$0xf0] }
 0x14d   :  { %2188 = vmatmul.bf16.vlgmr.msra.gmra.mxu1 %v5005_v55  ;;  %2214 = vmatmul.bf16.vlgmr.msra.gmra.mxu3 %v4940_v10 }
 0x14e   :  { %2258 = vmatpush.bf16.msrb.mxu3 %v3226_v39  ;;  %2236 = vmatpush.bf16.msrb.mxu1 %v3558_v50  ;;  %v2918_v39 = vor.u32 %v3796_v30, %v2915_v31  ;;  %v3055_v50 = vld [vmem:[%s5972_s5 + $0x21c] sm:$0xf0]  ;;  %v3950_v30 = vld [vmem:[%s5972_s5 + $0x5bc] sm:$0xf]  ;;  %v3531_v31 = vld [vmem:[%s5972_s5 + $0x5d4] sm:$0xf0] }
 0x14f   :  { %v3058_v60 = vor.u32 %v3831_v48, %v3055_v50  ;;  %v2978_v48 = vor.u32 %v3814_v41, %v2977_v40  ;;  %v3307_v50 = vld [vmem:[%s5972_s5 + $0x414] sm:$0xf0]  ;;  %v3968_v40 = vld [vmem:[%s5972_s5 + $0x648] sm:$0xf0] }
 0x150   :  { %2200 = vmatpush.bf16.msra.mxu2 %v2802_v57  ;;  %2222 = vmatpush.bf16.msrb.mxu0 %v3362_v58  ;;  %v2859_v57 = vld [vmem:[%s5972_s5 + $0x94] sm:$0xf0]  ;;  %v3922_v58 = vld [vmem:[%s5972_s5 + $0x4dc] sm:$0xf] }
 0x151   :  { %v2862_v3 = vor.u32 %v3782_v56, %v2859_v57  ;;  %v3936_v56 = vld [vmem:[%s5972_s5 + $0x54c] sm:$0xf]  ;;  %v3475_v57 = vld [vmem:[%s5972_s5 + $0x564] sm:$0xf0] }
 0x152   :  { %2259 = vmatpush.bf16.msrb.mxu3 %v3198_v53  ;;  %2237 = vmatpush.bf16.msrb.mxu1 %v3530_v0  ;;  %v2890_v53 = vor.u32 %v3789_v42, %v2887_v43  ;;  %v3964_v0 = vld [vmem:[%s5972_s5 + $0x62c] sm:$0xf]  ;;  %v3943_v43 = vld [vmem:[%s5972_s5 + $0x584] sm:$0xf] }
 0x153   :  { %2175 = vmatmul.bf16.vlgmr.msra.gmra.mxu0 %v5045_v16  ;;  %2201 = vmatmul.bf16.vlgmr.msra.gmra.mxu2 %v4961_v25  ;;  %v3590_v12 = vor.u32 %v3964_v0, %v3587_v1  ;;  %v3887_v0 = vld [vmem:[%s5972_s5 + $0x3c4] sm:$0xf]  ;;  %v3279_v1 = vld [vmem:[%s5972_s5 + $0x3dc] sm:$0xf0] }
 0x154   :  { %2245 = vmatpush.bf16.msrb.mxu2 %v3002_v61  ;;  %2223 = vmatpush.bf16.msrb.mxu0 %v3334_v6  ;;  %v3618_v61 = vor.u32 %v3971_v51, %v3615_v52  ;;  %v3775_v6 = vld [vmem:[%s5972_s5 + $0x44] sm:$0xf]  ;;  %v3506_v51 = vor.u32 %v3943_v43, %v3503_v44  ;;  %v2949_v52 = vld [vmem:[%s5972_s5 + $0x128] sm:$0xf]  ;;  %v3874_v43 = vld [vmem:[%s5972_s5 + $0x35c] sm:$0xf] }
 0x155   :  { %v3231_v44 = vld [vmem:[%s5972_s5 + $0x374] sm:$0xf0] }
 0x156   :  { %2260 = vmatpush.bf16.msrb.mxu3 %v3170_v2  ;;  %2238 = vmatpush.bf16.msrb.mxu1 %v3502_v13  ;;  %v3422_v2 = vor.u32 %v3922_v58, %v3419_v59  ;;  %v3230_v13 = vor.u32 %v3877_v5, %v3229_v4  ;;  %v3117_v58 = vld [vmem:[%s5972_s5 + $0x278] sm:$0xf]  ;;  %v3800_v4 = vld [vmem:[%s5972_s5 + $0x108] sm:$0xf0] }
 0x158   :  { %2246 = vmatpush.bf16.msrb.mxu2 %v2974_v9  ;;  %2224 = vmatpush.bf16.msrb.mxu0 %v3306_v21  ;;  %v3391_v9 = vld [vmem:[%s5972_s5 + $0x4bc] sm:$0xf0]  ;;  %v3768_v21 = vld [vmem:[%s5972_s5 + $0xc] sm:$0xf] }
 0x159   :  { %v3394_v18 = vor.u32 %v3915_v8, %v3391_v9  ;;  %v3282_v8 = vor.u32 %v3887_v0, %v3279_v1  ;;  %v3842_v9 = vld [vmem:[%s5972_s5 + $0x258] sm:$0xf0]  ;;  %v3007_v0 = vld [vmem:[%s5972_s5 + $0x1b4] sm:$0xf0] }
 0x15a   :  { %2261 = vmatpush.bf16.msrb.mxu3 %v3142_v17  ;;  %2239 = vmatpush.bf16.msrb.mxu1 %v3474_v29  ;;  %v2834_v17 = vor.u32 %v3775_v6, %v2831_v7  ;;  %v3202_v29 = vor.u32 %v3870_v20, %v3201_v19  ;;  %v3089_v7 = vld [vmem:[%s5972_s5 + $0x240] sm:$0xf]  ;;  %v3453_v19 = vld [vmem:[%s5972_s5 + $0x518] sm:$0xf]  ;;  %v3933_v20 = vld [vmem:[%s5972_s5 + $0x530] sm:$0xf0] }
 0x15b   :  { %v3454_v28 = vor.u32 %v3933_v20, %v3453_v19  ;;  %v3509_v19 = vld [vmem:[%s5972_s5 + $0x588] sm:$0xf]  ;;  %v3947_v20 = vld [vmem:[%s5972_s5 + $0x5a0] sm:$0xf0] }
 0x15c   :  { %2247 = vmatpush.bf16.msrb.mxu2 %v2946_v26  ;;  %2225 = vmatpush.bf16.msrb.mxu0 %v3278_v35  ;;  %v3562_v26 = vor.u32 %v3957_v14, %v3559_v15  ;;  %v3863_v35 = vld [vmem:[%s5972_s5 + $0x300] sm:$0xf0]  ;;  %v3880_v14 = vld [vmem:[%s5972_s5 + $0x38c] sm:$0xf]  ;;  %v3251_v15 = vld [vmem:[%s5972_s5 + $0x3a4] sm:$0xf0] }
 0x15d   :  { %2240 = vmatmul.bf16.vlgmr.msrb.gmra.mxu1 %v5005_v55  ;;  %v3174_v42 = vor.u32 %v3863_v35, %v3173_v34  ;;  %v3926_v34 = vld [vmem:[%s5972_s5 + $0x4f8] sm:$0xf0] }
 0x15e   :  { %2262 = vmatpush.bf16.msrb.mxu3 %v3114_v32  ;;  %2284 = vmatpush.bf16.msra.mxu1 %v3674_v33  ;;  %v2806_v32 = vor.u32 %v3768_v21, %v2803_v22  ;;  %v3366_v33 = vor.u32 %v3908_v23, %v3363_v24  ;;  %v3090_v21 = vor.u32 %v3842_v9, %v3089_v7  ;;  %v3061_v24 = vld [vmem:[%s5972_s5 + $0x208] sm:$0xf]  ;;  %v3860_v7 = vld [vmem:[%s5972_s5 + $0x2ec] sm:$0xf] }
 0x15f   :  { %v3254_v23 = vor.u32 %v3880_v14, %v3251_v15  ;;  %v3175_v9 = vld [vmem:[%s5972_s5 + $0x304] sm:$0xf0]  ;;  %v2979_v14 = vld [vmem:[%s5972_s5 + $0x17c] sm:$0xf0] }
 0x160   :  { %2248 = vmatpush.bf16.msrb.mxu2 %v2918_v39  ;;  %2226 = vmatpush.bf16.msrb.mxu0 %v3250_v49  ;;  %v3534_v39 = vor.u32 %v3950_v30, %v3531_v31  ;;  %v3894_v49 = vld [vmem:[%s5972_s5 + $0x3fc] sm:$0xf]  ;;  %v3975_v30 = vld [vmem:[%s5972_s5 + $0x680] sm:$0xf0]  ;;  %v2865_v31 = vld [vmem:[%s5972_s5 + $0x80] sm:$0xf] }
 0x161   :  { %v3310_v59 = vor.u32 %v3894_v49, %v3307_v50 }
 0x162   :  { %2263 = vmatpush.bf16.msrb.mxu3 %v3086_v46  ;;  %2285 = vmatpush.bf16.msra.mxu1 %v3646_v47  ;;  %v3145_v46 = vld [vmem:[%s5972_s5 + $0x2b0] sm:$0xf]  ;;  %v3856_v47 = vld [vmem:[%s5972_s5 + $0x2c8] sm:$0xf0] }
 0x163   :  { %2227 = vmatmul.bf16.vlgmr.msrb.gmra.mxu0 %v5045_v16 }
 0x164   :  { %2249 = vmatpush.bf16.msrb.mxu2 %v2890_v53  ;;  %2271 = vmatpush.bf16.msra.mxu0 %v3450_v54  ;;  %v3807_v53 = vld [vmem:[%s5972_s5 + $0x140] sm:$0xf0]  ;;  %v3146_v54 = vor.u32 %v3856_v47, %v3145_v46  ;;  %v3397_v47 = vld [vmem:[%s5972_s5 + $0x4a8] sm:$0xf] }
 0x165   :  { %v2950_v63 = vor.u32 %v3807_v53, %v2949_v52  ;;  %v3779_v46 = vld [vmem:[%s5972_s5 + $0x60] sm:$0xf0]  ;;  %v3565_v52 = vld [vmem:[%s5972_s5 + $0x5f8] sm:$0xf]  ;;  %v3961_v53 = vld [vmem:[%s5972_s5 + $0x610] sm:$0xf0] }
 0x166   :  { %2264 = vmatpush.bf16.msrb.mxu3 %v3058_v60  ;;  %2286 = vmatpush.bf16.msra.mxu1 %v3618_v61  ;;  %v3849_v60 = vld [vmem:[%s5972_s5 + $0x290] sm:$0xf0]  ;;  %v3677_v61 = vld [vmem:[%s5972_s5 + $0x6d8] sm:$0xf]  ;;  %v3566_v1 = vor.u32 %v3961_v53, %v3565_v52  ;;  %v3257_v52 = vld [vmem:[%s5972_s5 + $0x390] sm:$0xf] }
 0x167   :  { %v3118_v5 = vor.u32 %v3849_v60, %v3117_v58  ;;  %v3678_v6 = vor.u32 %v3989_v62, %v3677_v61  ;;  %v3203_v58 = vld [vmem:[%s5972_s5 + $0x33c] sm:$0xf0]  ;;  %v3772_v60 = vld [vmem:[%s5972_s5 + $0x28] sm:$0xf0]  ;;  %v3369_v61 = vld [vmem:[%s5972_s5 + $0x470] sm:$0xf] }
 0x168   :  { %2250 = vmatpush.bf16.msrb.mxu2 %v2862_v3  ;;  %2272 = vmatpush.bf16.msra.mxu0 %v3422_v2  ;;  %v3478_v3 = vor.u32 %v3936_v56, %v3475_v57  ;;  %v2921_v2 = vld [vmem:[%s5972_s5 + $0xf0] sm:$0xf]  ;;  %v3867_v57 = vld [vmem:[%s5972_s5 + $0x324] sm:$0xf]  ;;  %v3912_v62 = vld [vmem:[%s5972_s5 + $0x488] sm:$0xf0] }
 0x169   :  { %v3884_v53 = vld [vmem:[%s5972_s5 + $0x3a8] sm:$0xf0] }
 0x16a   :  { %2265 = vmatpush.bf16.msrb.mxu3 %v3030_v11  ;;  %2287 = vmatpush.bf16.msra.mxu1 %v3590_v12  ;;  %v3649_v11 = vld [vmem:[%s5972_s5 + $0x6a0] sm:$0xf]  ;;  %v3982_v12 = vld [vmem:[%s5972_s5 + $0x6b8] sm:$0xf0] }
 0x16b   :  { %v3650_v22 = vor.u32 %v3982_v12, %v3649_v11  ;;  %v3341_v11 = vld [vmem:[%s5972_s5 + $0x438] sm:$0xf]  ;;  %v3905_v12 = vld [vmem:[%s5972_s5 + $0x450] sm:$0xf0] }
 0x16c   :  { %2251 = vmatpush.bf16.msrb.mxu2 %v2834_v17  ;;  %2273 = vmatpush.bf16.msra.mxu0 %v3394_v18  ;;  %v2893_v17 = vld [vmem:[%s5972_s5 + $0xb8] sm:$0xf]  ;;  %v3793_v18 = vld [vmem:[%s5972_s5 + $0xd0] sm:$0xf0] }
 0x16d   :  { %2266 = vmatmul.bf16.vlgmr.msrb.gmra.mxu3 %v4940_v10  ;;  %v2894_v27 = vor.u32 %v3793_v18, %v2893_v17  ;;  %v3178_v17 = vor.u32 %v3860_v7, %v3175_v9  ;;  %v3342_v18 = vor.u32 %v3905_v12, %v3341_v11  ;;  %v3427_v7 = vld [vmem:[%s5972_s5 + $0x4fc] sm:$0xf0]  ;;  %v3825_v9 = vld [vmem:[%s5972_s5 + $0x1d4] sm:$0xf] }
 0x16e   :  { %2310 = vmatpush.bf16.msra.mxu3 %v3230_v13  ;;  %2288 = vmatpush.bf16.msra.mxu1 %v3562_v26  ;;  %v2922_v13 = vor.u32 %v3800_v4, %v2921_v2  ;;  %v3835_v26 = vld [vmem:[%s5972_s5 + $0x220] sm:$0xf0]  ;;  %v3370_v4 = vor.u32 %v3912_v62, %v3369_v61  ;;  %v3258_v61 = vor.u32 %v3884_v53, %v3257_v52 }
 0x16f   :  { %v3062_v35 = vor.u32 %v3835_v26, %v3061_v24  ;;  %v3313_v24 = vld [vmem:[%s5972_s5 + $0x400] sm:$0xf]  ;;  %v3898_v26 = vld [vmem:[%s5972_s5 + $0x418] sm:$0xf0]  ;;  %v3815_v52 = vld [vmem:[%s5972_s5 + $0x180] sm:$0xf0] }
 0x170   :  { %2252 = vmatpush.bf16.msrb.mxu2 %v2806_v32  ;;  %2274 = vmatpush.bf16.msra.mxu0 %v3366_v33  ;;  %v3786_v32 = vld [vmem:[%s5972_s5 + $0x98] sm:$0xf0]  ;;  %v3425_v33 = vld [vmem:[%s5972_s5 + $0x4e0] sm:$0xf] }
 0x171   :  { %v2866_v41 = vor.u32 %v3786_v32, %v2865_v31  ;;  %v3314_v32 = vor.u32 %v3898_v26, %v3313_v24 }
 0x172   :  { %2311 = vmatpush.bf16.msra.mxu3 %v3202_v29  ;;  %2289 = vmatpush.bf16.msra.mxu1 %v3534_v39  ;;  %v3621_v29 = vld [vmem:[%s5972_s5 + $0x668] sm:$0xf]  ;;  %v3593_v39 = vld [vmem:[%s5972_s5 + $0x630] sm:$0xf] }
 0x173   :  { %2253 = vmatmul.bf16.vlgmr.msrb.gmra.mxu2 %v4961_v25  ;;  %v3622_v37 = vor.u32 %v3975_v30, %v3621_v29  ;;  %v3594_v50 = vor.u32 %v3968_v40, %v3593_v39  ;;  %v3510_v29 = vor.u32 %v3947_v20, %v3509_v19  ;;  %v3481_v30 = vld [vmem:[%s5972_s5 + $0x550] sm:$0xf]  ;;  %v3285_v39 = vld [vmem:[%s5972_s5 + $0x3c8] sm:$0xf]  ;;  %v3891_v40 = vld [vmem:[%s5972_s5 + $0x3e0] sm:$0xf0] }
 0x174   :  { %2297 = vmatpush.bf16.msra.mxu2 %v3006_v36  ;;  %2275 = vmatpush.bf16.msra.mxu0 %v3338_v45  ;;  %v3033_v36 = vld [vmem:[%s5972_s5 + $0x1d0] sm:$0xf]  ;;  %v2837_v45 = vld [vmem:[%s5972_s5 + $0x48] sm:$0xf]  ;;  %v3878_v19 = vld [vmem:[%s5972_s5 + $0x378] sm:$0xf0] }
 0x175   :  { %v3034_v49 = vor.u32 %v3828_v38, %v3033_v36  ;;  %v3679_v38 = vld [vmem:[%s5972_s5 + $0x6f4] sm:$0xf0]  ;;  %v3776_v20 = vld [vmem:[%s5972_s5 + $0x4c] sm:$0xf] }
 0x176   :  { %2312 = vmatpush.bf16.msra.mxu3 %v3174_v42  ;;  %2290 = vmatpush.bf16.msra.mxu1 %v3506_v51  ;;  %v3426_v42 = vor.u32 %v3926_v34, %v3425_v33  ;;  %v3234_v51 = vor.u32 %v3874_v43, %v3231_v44  ;;  %v3940_v33 = vld [vmem:[%s5972_s5 + $0x568] sm:$0xf0]  ;;  %v3846_v34 = vld [vmem:[%s5972_s5 + $0x27c] sm:$0xf] }
 0x177   :  { %v3482_v43 = vor.u32 %v3940_v33, %v3481_v30  ;;  %v3871_v33 = vld [vmem:[%s5972_s5 + $0x340] sm:$0xf0] }
 0x178   :  { %2298 = vmatpush.bf16.msra.mxu2 %v2978_v48  ;;  %2276 = vmatpush.bf16.msra.mxu0 %v3310_v59  ;;  %v3919_v48 = vld [vmem:[%s5972_s5 + $0x4c0] sm:$0xf0]  ;;  %v2809_v59 = vld [vmem:[%s5972_s5 + $0x10] sm:$0xf] }
 0x179   :  { %v3398_v56 = vor.u32 %v3919_v48, %v3397_v47  ;;  %v2810_v2 = vor.u32 %v3772_v60, %v2809_v59  ;;  %v3091_v47 = vld [vmem:[%s5972_s5 + $0x25c] sm:$0xf0]  ;;  %v3286_v48 = vor.u32 %v3891_v40, %v3285_v39  ;;  %v3822_v39 = vld [vmem:[%s5972_s5 + $0x1b8] sm:$0xf0] }
 0x17a   :  { %2313 = vmatpush.bf16.msra.mxu3 %v3146_v54  ;;  %2291 = vmatpush.bf16.msra.mxu1 %v3478_v3  ;;  %v2838_v54 = vor.u32 %v3779_v46, %v2837_v45  ;;  %v3206_v3 = vor.u32 %v3867_v57, %v3203_v58  ;;  %v3839_v46 = vld [vmem:[%s5972_s5 + $0x244] sm:$0xf]  ;;  %v3930_v57 = vld [vmem:[%s5972_s5 + $0x51c] sm:$0xf]  ;;  %v3455_v58 = vld [vmem:[%s5972_s5 + $0x534] sm:$0xf0] }
 0x17b   :  { %v3094_v59 = vor.u32 %v3839_v46, %v3091_v47  ;;  %v3181_v46 = vld [vmem:[%s5972_s5 + $0x2f0] sm:$0xf] }
 0x17c   :  { %2299 = vmatpush.bf16.msra.mxu2 %v2950_v63  ;;  %2277 = vmatpush.bf16.msra.mxu0 %v3282_v8  ;;  %v3818_v63 = vld [vmem:[%s5972_s5 + $0x19c] sm:$0xf] }
 0x17d   :  { %2292 = vmatmul.bf16.vlgmr.msra.gmra.mxu1 %v5005_v55  ;;  %v3010_v8 = vor.u32 %v3818_v63, %v3007_v0  ;;  %v3832_v63 = vld [vmem:[%s5972_s5 + $0x20c] sm:$0xf]  ;;  %v3063_v0 = vld [vmem:[%s5972_s5 + $0x224] sm:$0xf0] }
 0x17e   :  { %2314 = vmatpush.bf16.msra.mxu3 %v3118_v5  ;;  %2336 = vmatpush.bf16.msrb.mxu1 %v3678_v6  ;;  %v3537_v5 = vld [vmem:[%s5972_s5 + $0x5c0] sm:$0xf]  ;;  %v3954_v6 = vld [vmem:[%s5972_s5 + $0x5d8] sm:$0xf0] }
 0x17f   :  { %v3538_v15 = vor.u32 %v3954_v6, %v3537_v5  ;;  %v2867_v5 = vld [vmem:[%s5972_s5 + $0x9c] sm:$0xf0]  ;;  %v3923_v6 = vld [vmem:[%s5972_s5 + $0x4e4] sm:$0xf] }
 0x180   :  { %2300 = vmatpush.bf16.msra.mxu2 %v2922_v13  ;;  %2278 = vmatpush.bf16.msra.mxu0 %v3254_v23  ;;  %v3811_v13 = vld [vmem:[%s5972_s5 + $0x164] sm:$0xf]  ;;  %v3147_v23 = vld [vmem:[%s5972_s5 + $0x2cc] sm:$0xf0] }
 0x182   :  { %2315 = vmatpush.bf16.msra.mxu3 %v3090_v21  ;;  %2337 = vmatpush.bf16.msrb.mxu1 %v3650_v22  ;;  %v3853_v21 = vld [vmem:[%s5972_s5 + $0x2b4] sm:$0xf]  ;;  %v2982_v22 = vor.u32 %v3811_v13, %v2979_v14  ;;  %v3035_v13 = vld [vmem:[%s5972_s5 + $0x1ec] sm:$0xf0] }
 0x183   :  { %2279 = vmatmul.bf16.vlgmr.msra.gmra.mxu0 %v5045_v16  ;;  %v3150_v31 = vor.u32 %v3853_v21, %v3147_v23  ;;  %v3965_v14 = vld [vmem:[%s5972_s5 + $0x634] sm:$0xf]  ;;  %v2839_v21 = vld [vmem:[%s5972_s5 + $0x64] sm:$0xf0]  ;;  %v3038_v24 = vor.u32 %v3825_v9, %v3035_v13  ;;  %v3888_v13 = vld [vmem:[%s5972_s5 + $0x3cc] sm:$0xf] }
 0x184   :  { %2301 = vmatpush.bf16.msra.mxu2 %v2894_v27  ;;  %2323 = vmatpush.bf16.msrb.mxu0 %v3454_v28  ;;  %v3804_v27 = vld [vmem:[%s5972_s5 + $0x12c] sm:$0xf]  ;;  %v2951_v28 = vld [vmem:[%s5972_s5 + $0x144] sm:$0xf0]  ;;  %v2842_v30 = vor.u32 %v3776_v20, %v2839_v21 }
 0x185   :  { %v2954_v36 = vor.u32 %v3804_v27, %v2951_v28  ;;  %v3399_v23 = vld [vmem:[%s5972_s5 + $0x4c4] sm:$0xf0]  ;;  %v3958_v28 = vld [vmem:[%s5972_s5 + $0x5fc] sm:$0xf] }
 0x186   :  { %2316 = vmatpush.bf16.msra.mxu3 %v3062_v35  ;;  %2338 = vmatpush.bf16.msrb.mxu1 %v3622_v37  ;;  %v3119_v35 = vld [vmem:[%s5972_s5 + $0x294] sm:$0xf0]  ;;  %v3986_v37 = vld [vmem:[%s5972_s5 + $0x6dc] sm:$0xf] }
 0x187   :  { %v3122_v44 = vor.u32 %v3846_v34, %v3119_v35  ;;  %v3682_v45 = vor.u32 %v3986_v37, %v3679_v38  ;;  %v3769_v34 = vld [vmem:[%s5972_s5 + $0x14] sm:$0xf]  ;;  %v2811_v35 = vld [vmem:[%s5972_s5 + $0x2c] sm:$0xf0]  ;;  %v3013_v38 = vld [vmem:[%s5972_s5 + $0x1a0] sm:$0xf] }
 0x188   :  { %2302 = vmatpush.bf16.msra.mxu2 %v2866_v41  ;;  %2324 = vmatpush.bf16.msrb.mxu0 %v3426_v42  ;;  %v3797_v41 = vld [vmem:[%s5972_s5 + $0xf4] sm:$0xf]  ;;  %v2923_v42 = vld [vmem:[%s5972_s5 + $0x10c] sm:$0xf0]  ;;  %v3014_v47 = vor.u32 %v3822_v39, %v3013_v38 }
 0x189   :  { %v3371_v37 = vld [vmem:[%s5972_s5 + $0x48c] sm:$0xf0] }
 0x18a   :  { %2317 = vmatpush.bf16.msra.mxu3 %v3034_v49  ;;  %2339 = vmatpush.bf16.msrb.mxu1 %v3594_v50  ;;  %v2926_v49 = vor.u32 %v3797_v41, %v2923_v42  ;;  %v3979_v50 = vld [vmem:[%s5972_s5 + $0x6a4] sm:$0xf]  ;;  %v2814_v42 = vor.u32 %v3769_v34, %v2811_v35  ;;  %v3934_v34 = vld [vmem:[%s5972_s5 + $0x538] sm:$0xf0] }
 0x18c   :  { %2303 = vmatpush.bf16.msra.mxu2 %v2838_v54  ;;  %2325 = vmatpush.bf16.msrb.mxu0 %v3398_v56  ;;  %v3790_v54 = vld [vmem:[%s5972_s5 + $0xbc] sm:$0xf]  ;;  %v2895_v56 = vld [vmem:[%s5972_s5 + $0xd4] sm:$0xf0] }
 0x18d   :  { %2318 = vmatmul.bf16.vlgmr.msra.gmra.mxu3 %v4940_v10  ;;  %v2898_v62 = vor.u32 %v3790_v54, %v2895_v56 }
 0x18e   :  { %2362 = vmatpush.bf16.msrb.mxu3 %v3234_v51  ;;  %2340 = vmatpush.bf16.msrb.mxu1 %v3566_v1  ;;  %v3651_v51 = vld [vmem:[%s5972_s5 + $0x6bc] sm:$0xf0]  ;;  %v3972_v1 = vld [vmem:[%s5972_s5 + $0x66c] sm:$0xf] }
 0x18f   :  { %v3654_v60 = vor.u32 %v3979_v50, %v3651_v51  ;;  %v3343_v50 = vld [vmem:[%s5972_s5 + $0x454] sm:$0xf0]  ;;  %v2985_v51 = vld [vmem:[%s5972_s5 + $0x168] sm:$0xf] }
 0x190   :  { %2304 = vmatpush.bf16.msra.mxu2 %v2810_v2  ;;  %2326 = vmatpush.bf16.msrb.mxu0 %v3370_v4  ;;  %v3623_v2 = vld [vmem:[%s5972_s5 + $0x684] sm:$0xf0]  ;;  %v3783_v4 = vld [vmem:[%s5972_s5 + $0x84] sm:$0xf] }
 0x191   :  { %v3626_v11 = vor.u32 %v3972_v1, %v3623_v2  ;;  %v2870_v12 = vor.u32 %v3783_v4, %v2867_v5  ;;  %v3808_v1 = vld [vmem:[%s5972_s5 + $0x148] sm:$0xf0]  ;;  %v3937_v2 = vld [vmem:[%s5972_s5 + $0x554] sm:$0xf] }
 0x192   :  { %2363 = vmatpush.bf16.msrb.mxu3 %v3206_v3  ;;  %2341 = vmatpush.bf16.msrb.mxu1 %v3538_v15  ;;  %v3458_v3 = vor.u32 %v3930_v57, %v3455_v58  ;;  %v3595_v15 = vld [vmem:[%s5972_s5 + $0x64c] sm:$0xf0]  ;;  %v3944_v57 = vld [vmem:[%s5972_s5 + $0x58c] sm:$0xf]  ;;  %v3511_v58 = vld [vmem:[%s5972_s5 + $0x5a4] sm:$0xf0] }
 0x193   :  { %2305 = vmatmul.bf16.vlgmr.msra.gmra.mxu2 %v4961_v25  ;;  %v3598_v26 = vor.u32 %v3965_v14, %v3595_v15  ;;  %v3287_v14 = vld [vmem:[%s5972_s5 + $0x3e4] sm:$0xf0]  ;;  %v2929_v15 = vld [vmem:[%s5972_s5 + $0xf8] sm:$0xf] }
 0x194   :  { %2349 = vmatpush.bf16.msrb.mxu2 %v3010_v8  ;;  %2327 = vmatpush.bf16.msrb.mxu0 %v3342_v18  ;;  %v3066_v8 = vor.u32 %v3832_v63, %v3063_v0  ;;  %v3237_v18 = vld [vmem:[%s5972_s5 + $0x360] sm:$0xf]  ;;  %v2957_v0 = vld [vmem:[%s5972_s5 + $0x130] sm:$0xf] }
 0x195   :  { %v3238_v27 = vor.u32 %v3878_v19, %v3237_v18  ;;  %v3315_v63 = vld [vmem:[%s5972_s5 + $0x41c] sm:$0xf0]  ;;  %v2958_v9 = vor.u32 %v3808_v1, %v2957_v0  ;;  %v3405_v1 = vld [vmem:[%s5972_s5 + $0x4b0] sm:$0xf] }
 0x196   :  { %2364 = vmatpush.bf16.msrb.mxu3 %v3178_v17  ;;  %2342 = vmatpush.bf16.msrb.mxu1 %v3510_v29  ;;  %v3430_v17 = vor.u32 %v3923_v6, %v3427_v7  ;;  %v3567_v29 = vld [vmem:[%s5972_s5 + $0x614] sm:$0xf0]  ;;  %v3483_v6 = vld [vmem:[%s5972_s5 + $0x56c] sm:$0xf0]  ;;  %v3125_v7 = vld [vmem:[%s5972_s5 + $0x280] sm:$0xf] }
 0x197   :  { %v3570_v40 = vor.u32 %v3958_v28, %v3567_v29  ;;  %v3486_v18 = vor.u32 %v3937_v2, %v3483_v6  ;;  %v3983_v28 = vld [vmem:[%s5972_s5 + $0x6c0] sm:$0xf0]  ;;  %v3881_v29 = vld [vmem:[%s5972_s5 + $0x394] sm:$0xf]  ;;  %v3573_v6 = vld [vmem:[%s5972_s5 + $0x600] sm:$0xf] }
 0x198   :  { %2350 = vmatpush.bf16.msrb.mxu2 %v2982_v22  ;;  %2328 = vmatpush.bf16.msrb.mxu0 %v3314_v32  ;;  %v3916_v22 = vld [vmem:[%s5972_s5 + $0x4ac] sm:$0xf]  ;;  %v3209_v32 = vld [vmem:[%s5972_s5 + $0x328] sm:$0xf] }
 0x199   :  { %v3210_v41 = vor.u32 %v3871_v33, %v3209_v32  ;;  %v3794_v32 = vld [vmem:[%s5972_s5 + $0xd8] sm:$0xf0]  ;;  %v3461_v33 = vld [vmem:[%s5972_s5 + $0x520] sm:$0xf] }
 0x19a   :  { %2365 = vmatpush.bf16.msrb.mxu3 %v3150_v31  ;;  %2343 = vmatpush.bf16.msrb.mxu1 %v3482_v43  ;;  %v3402_v31 = vor.u32 %v3916_v22, %v3399_v23  ;;  %v3097_v22 = vld [vmem:[%s5972_s5 + $0x248] sm:$0xf]  ;;  %v3843_v23 = vld [vmem:[%s5972_s5 + $0x260] sm:$0xf0] }
 0x19b   :  { %v3098_v35 = vor.u32 %v3843_v23, %v3097_v22 }
 0x19c   :  { %2351 = vmatpush.bf16.msrb.mxu2 %v2954_v36  ;;  %2329 = vmatpush.bf16.msrb.mxu0 %v3286_v48  ;;  %v3909_v36 = vld [vmem:[%s5972_s5 + $0x474] sm:$0xf]  ;;  %v3864_v48 = vld [vmem:[%s5972_s5 + $0x308] sm:$0xf0] }
 0x19d   :  { %2344 = vmatmul.bf16.vlgmr.msrb.gmra.mxu1 %v5005_v55  ;;  %v3374_v43 = vor.u32 %v3909_v36, %v3371_v37  ;;  %v3182_v54 = vor.u32 %v3864_v48, %v3181_v46  ;;  %v5823_v37 = vld [vmem:[%s5974_s6] sm:$0xff]  ;;  %v2873_v46 = vld [vmem:[%s5972_s5 + $0x88] sm:$0xf] }
 0x19e   :  { %2366 = vmatpush.bf16.msrb.mxu3 %v3122_v44  ;;  %2388 = vmatpush.bf16.msra.mxu1 %v3682_v45  ;;  %v3951_v44 = vld [vmem:[%s5972_s5 + $0x5c4] sm:$0xf]  ;;  %v3539_v45 = vld [vmem:[%s5972_s5 + $0x5dc] sm:$0xf0]  ;;  %v923_v48 = vperm.slane %v5823_v37, 0 }
 0x19f   :  { %v3542_v53 = vor.u32 %v3951_v44, %v3539_v45  ;;  %v3462_v44 = vor.u32 %v3934_v34, %v3461_v33  ;;  %v3976_v45 = vld [vmem:[%s5972_s5 + $0x688] sm:$0xf0]  ;;  %v3517_v33 = vld [vmem:[%s5972_s5 + $0x590] sm:$0xf]  ;;  %v924_v34 = vperm.slane %v5823_v37, 1 }
 0x1a0   :  { %2352 = vmatpush.bf16.msrb.mxu2 %v2926_v49  ;;  %2330 = vmatpush.bf16.msrb.mxu0 %v3258_v61  ;;  %v3902_v49 = vld [vmem:[%s5972_s5 + $0x43c] sm:$0xf]  ;;  %v3857_v61 = vld [vmem:[%s5972_s5 + $0x2d0] sm:$0xf0] }
 0x1a1   :  { %v3346_v56 = vor.u32 %v3902_v49, %v3343_v50  ;;  %v3433_v49 = vld [vmem:[%s5972_s5 + $0x4e8] sm:$0xf]  ;;  %v3927_v50 = vld [vmem:[%s5972_s5 + $0x500] sm:$0xf0] }
 0x1a2   :  { %2367 = vmatpush.bf16.msrb.mxu3 %v3094_v59  ;;  %2389 = vmatpush.bf16.msra.mxu1 %v3654_v60  ;;  %v3153_v59 = vld [vmem:[%s5972_s5 + $0x2b8] sm:$0xf]  ;;  %v2986_v60 = vor.u32 %v3815_v52, %v2985_v51 }
 0x1a3   :  { %2331 = vmatmul.bf16.vlgmr.msrb.gmra.mxu0 %v5045_v16  ;;  %v3154_v4 = vor.u32 %v3857_v61, %v3153_v59  ;;  %v3969_v61 = vld [vmem:[%s5972_s5 + $0x650] sm:$0xf0] }
 0x1a4   :  { %2353 = vmatpush.bf16.msrb.mxu2 %v2898_v62  ;;  %2375 = vmatpush.bf16.msra.mxu0 %v3458_v3  ;;  %v3895_v62 = vld [vmem:[%s5972_s5 + $0x404] sm:$0xf]  ;;  %v3514_v3 = vor.u32 %v3944_v57, %v3511_v58  ;;  %v3829_v57 = vld [vmem:[%s5972_s5 + $0x1f0] sm:$0xf0]  ;;  %v3601_v58 = vld [vmem:[%s5972_s5 + $0x638] sm:$0xf] }
 0x1a5   :  { %v3318_v5 = vor.u32 %v3895_v62, %v3315_v63  ;;  %v2845_v62 = vld [vmem:[%s5972_s5 + $0x50] sm:$0xf]  ;;  %v3780_v63 = vld [vmem:[%s5972_s5 + $0x68] sm:$0xf0] }
 0x1a6   :  { %2368 = vmatpush.bf16.msrb.mxu3 %v3066_v8  ;;  %2390 = vmatpush.bf16.msra.mxu1 %v3626_v11  ;;  %v3850_v8 = vld [vmem:[%s5972_s5 + $0x298] sm:$0xf0]  ;;  %v3685_v11 = vld [vmem:[%s5972_s5 + $0x6e0] sm:$0xf] }
 0x1a7   :  { %v3126_v20 = vor.u32 %v3850_v8, %v3125_v7 }
 0x1a8   :  { %2354 = vmatpush.bf16.msrb.mxu2 %v2870_v12  ;;  %2376 = vmatpush.bf16.msra.mxu0 %v3430_v17  ;;  %v3990_v12 = vld [vmem:[%s5972_s5 + $0x6f8] sm:$0xf0]  ;;  %v3801_v17 = vld [vmem:[%s5972_s5 + $0x110] sm:$0xf0] }
 0x1a9   :  { %v3686_v21 = vor.u32 %v3990_v12, %v3685_v11  ;;  %v2817_v11 = vld [vmem:[%s5972_s5 + $0x18] sm:$0xf]  ;;  %v3773_v12 = vld [vmem:[%s5972_s5 + $0x30] sm:$0xf0] }
 0x1aa   :  { %2369 = vmatpush.bf16.msrb.mxu3 %v3038_v24  ;;  %2391 = vmatpush.bf16.msra.mxu1 %v3598_v26  ;;  %v3290_v24 = vor.u32 %v3888_v13, %v3287_v14  ;;  %v2930_v26 = vor.u32 %v3801_v17, %v2929_v15  ;;  %v3377_v14 = vld [vmem:[%s5972_s5 + $0x478] sm:$0xf]  ;;  %v3913_v15 = vld [vmem:[%s5972_s5 + $0x490] sm:$0xf0]  ;;  %v2818_v22 = vor.u32 %v3773_v12, %v2817_v11 }
 0x1ac   :  { %2355 = vmatpush.bf16.msrb.mxu2 %v2842_v30  ;;  %2377 = vmatpush.bf16.msra.mxu0 %v3402_v31  ;;  %v3259_v30 = vld [vmem:[%s5972_s5 + $0x3ac] sm:$0xf0]  ;;  %v2901_v31 = vld [vmem:[%s5972_s5 + $0xc0] sm:$0xf] }
 0x1ad   :  { %2370 = vmatmul.bf16.vlgmr.msrb.gmra.mxu3 %v4940_v10  ;;  %v3262_v38 = vor.u32 %v3881_v29, %v3259_v30  ;;  %v2902_v39 = vor.u32 %v3794_v32, %v2901_v31  ;;  %v3906_v29 = vld [vmem:[%s5972_s5 + $0x458] sm:$0xf0] }
 0x1ae   :  { %2414 = vmatpush.bf16.msra.mxu3 %v3238_v27  ;;  %2392 = vmatpush.bf16.msra.mxu1 %v3570_v40  ;;  %v3657_v27 = vld [vmem:[%s5972_s5 + $0x6a8] sm:$0xf]  ;;  %v3069_v40 = vld [vmem:[%s5972_s5 + $0x210] sm:$0xf] }
 0x1af   :  { %v3658_v36 = vor.u32 %v3983_v28, %v3657_v27  ;;  %v3349_v28 = vld [vmem:[%s5972_s5 + $0x440] sm:$0xf] }
 0x1b0   :  { %2356 = vmatpush.bf16.msrb.mxu2 %v2814_v42  ;;  %2378 = vmatpush.bf16.msra.mxu0 %v3374_v43  ;;  %v5788_v19 = vpop.f32.mrf.mxu3  ;;  %v3629_v42 = vld [vmem:[%s5972_s5 + $0x670] sm:$0xf]  ;;  %v3350_v32 = vor.u32 %v3906_v29, %v3349_v28  ;;  %v927_v29 = vperm.slane %v5823_v37, 4 }
 0x1b2   :  { %2415 = vmatpush.bf16.msra.mxu3 %v3210_v41  ;;  %2393 = vmatpush.bf16.msra.mxu1 %v3542_v53  ;;  %v3836_v41 = vld [vmem:[%s5972_s5 + $0x228] sm:$0xf0]  ;;  %v3630_v53 = vor.u32 %v3976_v45, %v3629_v42 }
 0x1b3   :  { %2357 = vmatmul.bf16.vlgmr.msrb.gmra.mxu2 %v4961_v25  ;;  %v3070_v52 = vor.u32 %v3836_v41, %v3069_v40 }
 0x1b4   :  { %2401 = vmatpush.bf16.msra.mxu2 %v3014_v47  ;;  %2379 = vmatpush.bf16.msra.mxu0 %v3346_v56  ;;  %v3787_v47 = vld [vmem:[%s5972_s5 + $0xa0] sm:$0xf0]  ;;  %v3041_v56 = vld [vmem:[%s5972_s5 + $0x1d8] sm:$0xf] }
 0x1b5   :  { %v3042_v2 = vor.u32 %v3829_v57, %v3041_v56 }
 0x1b6   :  { %2416 = vmatpush.bf16.msra.mxu3 %v3182_v54  ;;  %2394 = vmatpush.bf16.msra.mxu1 %v3514_v3  ;;  %v2098_v43 = vpop.f32.mrf.mxu2  ;;  %v2874_v54 = vor.u32 %v3787_v47, %v2873_v46  ;;  %v3920_v3 = vld [vmem:[%s5972_s5 + $0x4c8] sm:$0xf0] }
 0x1b7   :  { %v2099_v0 = vadd.f32 %v2098_v43, %v923_v48  ;;  %v3406_v8 = vor.u32 %v3920_v3, %v3405_v1  ;;  %v3489_v43 = vld [vmem:[%s5972_s5 + $0x558] sm:$0xf]  ;;  %v3892_v47 = vld [vmem:[%s5972_s5 + $0x3e8] sm:$0xf0] }
 0x1b8   :  { %2402 = vmatpush.bf16.msra.mxu2 %v2986_v60  ;;  %2380 = vmatpush.bf16.msra.mxu0 %v3318_v5  ;;  %v2113_v51 = vpop.f32.mrf.mxu3  ;;  %v3434_v60 = vor.u32 %v3927_v50, %v3433_v49  ;;  %v2846_v5 = vor.u32 %v3780_v63, %v2845_v62  ;;  %v925_v62 = vperm.slane %v5823_v37, 2 }
 0x1b9   :  { %v2112_v13 = vadd.f32 %v5788_v19, %v2099_v0  ;;  %v3545_v19 = vld [vmem:[%s5972_s5 + $0x5c8] sm:$0xf] }
 0x1ba   :  { %2417 = vmatpush.bf16.msra.mxu3 %v3154_v4  ;;  %2395 = vmatpush.bf16.msra.mxu1 %v3486_v18  ;;  %v2137_v59 = vpop.f32.mrf.mxu1  ;;  %v3602_v4 = vor.u32 %v3969_v61, %v3601_v58 }
 0x1bc   :  { %2403 = vmatpush.bf16.msra.mxu2 %v2958_v9  ;;  %2381 = vmatpush.bf16.msra.mxu0 %v3290_v24  ;;  %v3962_v9 = vld [vmem:[%s5972_s5 + $0x618] sm:$0xf0]  ;;  %v3378_v24 = vor.u32 %v3913_v15, %v3377_v14 }
 0x1bd   :  { %2396 = vmatmul.bf16.vlgmr.msra.gmra.mxu1 %v5005_v55 }
 0x1be   :  { %2418 = vmatpush.bf16.msra.mxu3 %v3126_v20  ;;  %2440 = vmatpush.bf16.msrb.mxu1 %v3686_v21  ;;  %v2100_v7 = vpop.f32.mrf.mxu2  ;;  %v3574_v21 = vor.u32 %v3962_v9, %v3573_v6 }
 0x1c0   :  { %2404 = vmatpush.bf16.msra.mxu2 %v2930_v26  ;;  %2382 = vmatpush.bf16.msra.mxu0 %v3262_v38  ;;  %v2124_v17 = vpop.f32.mrf.mxu0  ;;  %v2163_v18 = vpop.f32.mrf.mxu3  ;;  %v3955_v26 = vld [vmem:[%s5972_s5 + $0x5e0] sm:$0xf0] }
 0x1c1   :  { %v2125_v20 = vadd.f32 %v2124_v17, %v2112_v13  ;;  %v3546_v30 = vor.u32 %v3955_v26, %v3545_v19  ;;  %v926_v13 = vperm.slane %v5823_v37, 3 }
 0x1c2   :  { %2419 = vmatpush.bf16.msra.mxu3 %v3098_v35  ;;  %2441 = vmatpush.bf16.msrb.mxu1 %v3658_v36  ;;  %v2139_v23 = vpop.f32.mrf.mxu1  ;;  %v3321_v35 = vld [vmem:[%s5972_s5 + $0x408] sm:$0xf]  ;;  %v3899_v36 = vld [vmem:[%s5972_s5 + $0x420] sm:$0xf0] }
 0x1c3   :  { %2383 = vmatmul.bf16.vlgmr.msra.gmra.mxu0 %v5045_v16  ;;  %v2138_v27 = vadd.f32 %v2137_v59, %v2125_v20  ;;  %v3322_v42 = vor.u32 %v3899_v36, %v3321_v35 }
 0x1c4   :  { %2405 = vmatpush.bf16.msra.mxu2 %v2902_v39  ;;  %2427 = vmatpush.bf16.msrb.mxu0 %v3462_v44  ;;  %v3941_v44 = vld [vmem:[%s5972_s5 + $0x570] sm:$0xf0] }
 0x1c5   :  { %3991 = vtanh.f32 %v2138_v27  ;;  %v3490_v48 = vor.u32 %v3941_v44, %v3489_v43  ;;  %v928_v43 = vperm.slane %v5823_v37, 5 }
 0x1c6   :  { %2420 = vmatpush.bf16.msra.mxu3 %v3070_v52  ;;  %2442 = vmatpush.bf16.msrb.mxu1 %v3630_v53  ;;  %v2150_v31 = vpop.f32.mrf.mxu2  ;;  %v3265_v52 = vld [vmem:[%s5972_s5 + $0x398] sm:$0xf]  ;;  %v3885_v53 = vld [vmem:[%s5972_s5 + $0x3b0] sm:$0xf0] }
 0x1c7   :  { %v2151_v46 = vadd.f32 %v2150_v31, %v924_v34  ;;  %v3266_v59 = vor.u32 %v3885_v53, %v3265_v52 }
 0x1c8   :  { %2406 = vmatpush.bf16.msra.mxu2 %v2874_v54  ;;  %2428 = vmatpush.bf16.msrb.mxu0 %v3434_v60  ;;  %v2126_v38 = vpop.f32.mrf.mxu0  ;;  %v2165_v39 = vpop.f32.mrf.mxu3 }
 0x1c9   :  { %v2164_v51 = vadd.f32 %v2163_v18, %v2151_v46 }
 0x1ca   :  { %2421 = vmatpush.bf16.msra.mxu3 %v3042_v2  ;;  %2443 = vmatpush.bf16.msrb.mxu1 %v3602_v4  ;;  %v2189_v41 = vpop.f32.mrf.mxu1 }
 0x1cb   :  { %v3992_v45 = vpop.eup %3991 }
 0x1cc   :  { %2407 = vmatpush.bf16.msra.mxu2 %v2846_v5  ;;  %2429 = vmatpush.bf16.msrb.mxu0 %v3406_v8  ;;  %2460 = vst [vmem:[%s5975_s7] sm:$0xff] %v3992_v45 }
 0x1cd   :  { %2422 = vmatmul.bf16.vlgmr.msra.gmra.mxu3 %v4940_v10  ;;  %v3948_v10 = vld [vmem:[%s5972_s5 + $0x5a8] sm:$0xf0] }
 0x1ce   :  { %2444 = vmatpush.bf16.msrb.mxu1 %v3574_v21  ;;  %v3518_v40 = vor.u32 %v3948_v10, %v3517_v33  ;;  %v2152_v49 = vpop.f32.mrf.mxu2 }
 0x1d0   :  { %2408 = vmatpush.bf16.msra.mxu2 %v2818_v22  ;;  %2430 = vmatpush.bf16.msrb.mxu0 %v3378_v24  ;;  %v2176_v54 = vpop.f32.mrf.mxu0  ;;  %v2215_v56 = vpop.f32.mrf.mxu3 }
 0x1d1   :  { %v2177_v57 = vadd.f32 %v2176_v54, %v2164_v51 }
 0x1d2   :  { %2445 = vmatpush.bf16.msrb.mxu1 %v3546_v30  ;;  %v2191_v58 = vpop.f32.mrf.mxu1 }
 0x1d3   :  { %2409 = vmatmul.bf16.vlgmr.msra.gmra.mxu2 %v4961_v25  ;;  %v3293_v25 = vld [vmem:[%s5972_s5 + $0x3d0] sm:$0xf]  ;;  %v2190_v60 = vadd.f32 %v2189_v41, %v2177_v57  ;;  %v929_v57 = vperm.slane %v5823_v37, 6 }
 0x1d4   :  { %2431 = vmatpush.bf16.msrb.mxu0 %v3350_v32  ;;  %v3294_v50 = vor.u32 %v3892_v47, %v3293_v25 }
 0x1d5   :  { %3993 = vtanh.f32 %v2190_v60 }
 0x1d6   :  { %2446 = vmatpush.bf16.msrb.mxu1 %v3518_v40  ;;  %v2202_v61 = vpop.f32.mrf.mxu2 }
 0x1d7   :  { %v2203_v2 = vadd.f32 %v2202_v61, %v925_v62 }
 0x1d8   :  { %2432 = vmatpush.bf16.msrb.mxu0 %v3322_v42  ;;  %v2178_v63 = vpop.f32.mrf.mxu0  ;;  %v2217_v0 = vpop.f32.mrf.mxu3 }
 0x1d9   :  { %v2216_v5 = vadd.f32 %v2215_v56, %v2203_v2 }
 0x1da   :  { %2447 = vmatpush.bf16.msrb.mxu1 %v3490_v48  ;;  %v2241_v1 = vpop.f32.mrf.mxu1 }
 0x1db   :  { %v3994_v3 = vpop.eup %3993 }
 0x1dc   :  { %2433 = vmatpush.bf16.msrb.mxu0 %v3294_v50  ;;  %2461 = vst [vmem:[%s5975_s7 + $0x8] sm:$0xff] %v3994_v3 }
 0x1dd   :  { %2448 = vmatmul.bf16.vlgmr.msrb.gmra.mxu1 %v5005_v55 }
 0x1de   :  { %v2204_v4 = vpop.f32.mrf.mxu2 }
 0x1e0   :  { %2434 = vmatpush.bf16.msrb.mxu0 %v3266_v59  ;;  %v2228_v6 = vpop.f32.mrf.mxu0 }
 0x1e1   :  { %v2229_v55 = vadd.f32 %v2228_v6, %v2216_v5 }
 0x1e2   :  { %v2243_v7 = vpop.f32.mrf.mxu1 }
 0x1e3   :  { %2435 = vmatmul.bf16.vlgmr.msrb.gmra.mxu0 %v5045_v16  ;;  %v2242_v8 = vadd.f32 %v2241_v1, %v2229_v55 }
 0x1e5   :  { %3995 = vtanh.f32 %v2242_v8 }
 0x1e8   :  { %v2230_v9 = vpop.f32.mrf.mxu0 }
 0x1eb   :  { %v3996_v11 = vpop.eup %3995 }
 0x1ec   :  { %2462 = vst [vmem:[%s5975_s7 + $0x10] sm:$0xff] %v3996_v11 }
 0x1f0   :  { %v2267_v16 = vpop.f32.mrf.mxu3 }
 0x1f6   :  { %v2254_v12 = vpop.f32.mrf.mxu2 }
 0x1f7   :  { %v2255_v17 = vadd.f32 %v2254_v12, %v926_v13 }
 0x1f8   :  { %v2269_v14 = vpop.f32.mrf.mxu3 }
 0x1f9   :  { %v2268_v20 = vadd.f32 %v2267_v16, %v2255_v17 }
 0x1fa   :  { %v2293_v15 = vpop.f32.mrf.mxu1 }
 0x1fe   :  { %v2256_v18 = vpop.f32.mrf.mxu2 }
 0x200   :  { %v2280_v21 = vpop.f32.mrf.mxu0 }
 0x201   :  { %v2281_v22 = vadd.f32 %v2280_v21, %v2268_v20 }
 0x202   :  { %v2295_v23 = vpop.f32.mrf.mxu1 }
 0x203   :  { %v2294_v24 = vadd.f32 %v2293_v15, %v2281_v22 }
 0x205   :  { %3997 = vtanh.f32 %v2294_v24 }
 0x208   :  { %v2282_v19 = vpop.f32.mrf.mxu0 }
 0x20b   :  { %v3998_v26 = vpop.eup %3997 }
 0x20c   :  { %2463 = vst [vmem:[%s5975_s7 + $0x18] sm:$0xff] %v3998_v26 }
 0x210   :  { %v2319_v27 = vpop.f32.mrf.mxu3 }
 0x216   :  { %v2306_v28 = vpop.f32.mrf.mxu2 }
 0x217   :  { %v2307_v32 = vadd.f32 %v2306_v28, %v927_v29 }
 0x218   :  { %v2321_v30 = vpop.f32.mrf.mxu3 }
 0x219   :  { %v2320_v10 = vadd.f32 %v2319_v27, %v2307_v32 }
 0x21a   :  { %v2345_v31 = vpop.f32.mrf.mxu1 }
 0x21e   :  { %v2308_v33 = vpop.f32.mrf.mxu2 }
 0x220   :  { %v2332_v34 = vpop.f32.mrf.mxu0 }
 0x221   :  { %v2333_v35 = vadd.f32 %v2332_v34, %v2320_v10 }
 0x222   :  { %v2347_v36 = vpop.f32.mrf.mxu1 }
 0x223   :  { %v2346_v38 = vadd.f32 %v2345_v31, %v2333_v35 }
 0x225   :  { %3999 = vtanh.f32 %v2346_v38 }
 0x228   :  { %v2334_v39 = vpop.f32.mrf.mxu0 }
 0x22b   :  { %v4000_v40 = vpop.eup %3999 }
 0x22c   :  { %2464 = vst [vmem:[%s5975_s7 + $0x20] sm:$0xff] %v4000_v40 }
 0x230   :  { %v2371_v41 = vpop.f32.mrf.mxu3 }
 0x236   :  { %v2358_v42 = vpop.f32.mrf.mxu2 }
 0x237   :  { %v2359_v46 = vadd.f32 %v2358_v42, %v928_v43 }
 0x238   :  { %v2373_v44 = vpop.f32.mrf.mxu3 }
 0x239   :  { %v2372_v47 = vadd.f32 %v2371_v41, %v2359_v46 }
 0x23a   :  { %v2397_v45 = vpop.f32.mrf.mxu1 }
 0x23e   :  { %v2360_v25 = vpop.f32.mrf.mxu2 }
 0x240   :  { %v2384_v48 = vpop.f32.mrf.mxu0 }
 0x241   :  { %v2385_v49 = vadd.f32 %v2384_v48, %v2372_v47 }
 0x242   :  { %v2399_v50 = vpop.f32.mrf.mxu1 }
 0x243   :  { %v2398_v51 = vadd.f32 %v2397_v45, %v2385_v49 }
 0x245   :  { %4001 = vtanh.f32 %v2398_v51 }
 0x248   :  { %v2386_v52 = vpop.f32.mrf.mxu0 }
 0x24b   :  { %v4002_v53 = vpop.eup %4001 }
 0x24c   :  { %2465 = vst [vmem:[%s5975_s7 + $0x28] sm:$0xff] %v4002_v53 }
 0x250   :  { %v2423_v54 = vpop.f32.mrf.mxu3 }
 0x256   :  { %v2410_v56 = vpop.f32.mrf.mxu2 }
 0x257   :  { %v2411_v59 = vadd.f32 %v2410_v56, %v929_v57 }
 0x258   :  { %v2425_v58 = vpop.f32.mrf.mxu3 }
 0x259   :  { %v2424_v62 = vadd.f32 %v2423_v54, %v2411_v59 }
 0x25a   :  { %v2449_v60 = vpop.f32.mrf.mxu1 }
 0x25e   :  { %v2412_v61 = vpop.f32.mrf.mxu2 }
 0x260   :  { %v2436_v63 = vpop.f32.mrf.mxu0 }
 0x261   :  { %v2437_v0 = vadd.f32 %v2436_v63, %v2424_v62 }
 0x262   :  { %v2451_v3 = vpop.f32.mrf.mxu1 }
 0x263   :  { %v2450_v1 = vadd.f32 %v2449_v60, %v2437_v0 }
 0x265   :  { %4003 = vtanh.f32 %v2450_v1 }
 0x268   :  { %v2438_v2 = vpop.f32.mrf.mxu0 }
 0x26b   :  { %v4004_v4 = vpop.eup %4003 }
 0x26c   :  { %2466 = vst [vmem:[%s5975_s7 + $0x30] sm:$0xff] %v4004_v4 }

</bundles_post_ra>
